<compile_context>
chip_gen: v7x
topology: tpu7x:2x2x1
jax: 0.10.0
libtpu: 0.0.40
codegen_flags: <defaults>
</compile_context>

<pallas_src>
import jax
import jax.numpy as jnp
from jax import lax
from jax.experimental import pallas as pl
from jax.experimental.pallas import tpu as pltpu


# ----------------------------------------------------------------------------
# helpers
# ----------------------------------------------------------------------------
def _cdiv(a, b):
    return (a + b - 1) // b


def _round_up(n, m):
    return _cdiv(n, m) * m


def _pad2(a, rows, cols):
    return jnp.pad(a, ((0, rows - a.shape[0]), (0, cols - a.shape[1])))


def _vmem_limit_bytes(need_bytes):
    """Per-generation VMEM cap: ~56 MiB on v7x (64 MiB phys), <=100 MiB on v5e/v6e."""
    try:
        phys = int(pltpu.get_tpu_info().vmem_capacity_bytes)
    except Exception:
        phys = 64 * 1024 * 1024
    cap = min(phys - 8 * 1024 * 1024, 100 * 1024 * 1024)
    cap = max(cap, 16 * 1024 * 1024)
    return int(min(cap, max(4 * need_bytes, 32 * 1024 * 1024)))


# ----------------------------------------------------------------------------
# kernel
# ----------------------------------------------------------------------------
def _make_kernel(nd):
    """Grid = (batch_tiles, 2*nd).  Inner steps 0..nd-1 accumulate x@W1 and the
    row sum-of-squares; step nd-1 finalizes the encoder + decoder hidden (h2);
    steps nd..2*nd-1 stream W4 column blocks and write output column blocks."""

    def kernel(x_ref, w1_ref, b1_ref, w2_ref, b2_ref, w3_ref, b3_ref,
               w4_ref, b4_ref, o_ref, acc_ref, ssq_ref, h2_ref):
        j = pl.program_id(1)

        @pl.when(j == 0)
        def _init():
            acc_ref[...] = jnp.zeros_like(acc_ref)
            ssq_ref[...] = jnp.zeros_like(ssq_ref)

        @pl.when(j < nd)
        def _accumulate():
            xb = x_ref[...]                                    # (bb, dk) bf16
            xf = xb.astype(jnp.float32)
            ssq_ref[...] += jnp.sum(xf * xf, axis=-1, keepdims=True)
            acc_ref[...] += jnp.dot(xb, w1_ref[...],
                                    preferred_element_type=jnp.float32)

        @pl.when(j == nd - 1)
        def _encode():
            # F.normalize: x / max(||x||, 1e-12) == (x@W1) * rsqrt(max(ss,1e-24))
            inv_norm = lax.rsqrt(jnp.maximum(ssq_ref[...], 1e-24))
            # Dropout(p=0.5): eval-mode identity.
            h1 = jnp.tanh(
                (acc_ref[...] * inv_norm + b1_ref[...]).astype(jnp.bfloat16))
            z = jnp.tanh(
                (jnp.dot(h1, w2_ref[...], preferred_element_type=jnp.float32)
                 + b2_ref[...]).astype(jnp.bfloat16))
            h2_ref[...] = jnp.tanh(
                (jnp.dot(z, w3_ref[...], preferred_element_type=jnp.float32)
                 + b3_ref[...]).astype(jnp.bfloat16))

        @pl.when(j >= nd)
        def _decode():
            out = jnp.dot(h2_ref[...], w4_ref[...],
                          preferred_element_type=jnp.float32) + b4_ref[...]
            o_ref[...] = out.astype(o_ref.dtype)

    return kernel


# ----------------------------------------------------------------------------
# wrapper
# ----------------------------------------------------------------------------
def prepare_params(params, *, block_d=512):
    """Hoisted (call-once) padding + bf16 cast of the weights/biases."""
    D, H = params["w1"].shape
    L = params["w2"].shape[1]
    dk = min(block_d, _round_up(D, 128))       # D-axis tile (multiple of 128)
    Dp = _round_up(D, dk)
    Hp = _round_up(H, 128)
    Lp = _round_up(L, 128)

    prepped = {
        "w1": _pad2(params["w1"], Dp, Hp).astype(jnp.bfloat16),
        "b1": _pad2(params["b1"], 1, Hp).astype(jnp.float32),
        "w2": _pad2(params["w2"], Hp, Lp).astype(jnp.bfloat16),
        "b2": _pad2(params["b2"], 1, Lp).astype(jnp.float32),
        "w3": _pad2(params["w3"], Lp, Hp).astype(jnp.bfloat16),
        "b3": _pad2(params["b3"], 1, Hp).astype(jnp.float32),
        "w4": _pad2(params["w4"], Hp, Dp).astype(jnp.bfloat16),
        "b4": _pad2(params["b4"], 1, Dp).astype(jnp.float32),
    }
    meta = dict(D=D, H=H, L=L, Dp=Dp, Hp=Hp, Lp=Lp, dk=dk)
    return prepped, meta


def multi_dae_forward(x, prepped, meta, *, block_batch=256):
    """x: [B, input_dim] float32.  prepped/meta from prepare_params()."""
    B, D = x.shape
    assert D == meta["D"]
    Dp, Hp, Lp, dk = meta["Dp"], meta["Hp"], meta["Lp"], meta["dk"]
    nd = Dp // dk

    # Adaptive batch tile: fewest, best-filled tiles (minimal zero-padding).
    n_bt = max(1, _cdiv(B, block_batch))
    bb = _round_up(_cdiv(B, n_bt), 8)
    Bp = _round_up(B, bb)

    # x streamed as bf16 (halves HBM read traffic for the dominant input).
    xp = _pad2(x.astype(jnp.bfloat16), Bp, Dp)

    w1, b1 = prepped["w1"], prepped["b1"]
    w2, b2 = prepped["w2"], prepped["b2"]
    w3, b3 = prepped["w3"], prepped["b3"]
    w4, b4 = prepped["w4"], prepped["b4"]

    def resident(shape):
        # Whole-array block, identical every step -> single-buffer it.
        return pl.BlockSpec(shape, lambda i, j: (0, 0),
                            pipeline_mode=pl.Buffered(1))

    in_specs = [
        # x: column blocks during phase 1, held constant during phase 2
        pl.BlockSpec((bb, dk), lambda i, j: (i, jnp.minimum(j, nd - 1))),
        # W1: row blocks streamed during phase 1
        pl.BlockSpec((dk, Hp), lambda i, j: (jnp.minimum(j, nd - 1), 0)),
        resident((1, Hp)),    # b1
        resident((Hp, Lp)),   # w2
        resident((1, Lp)),    # b2
        resident((Lp, Hp)),   # w3
        resident((1, Hp)),    # b3
        # W4 / b4: column blocks streamed during phase 2
        pl.BlockSpec((Hp, dk), lambda i, j: (0, jnp.maximum(j - nd, 0))),
        pl.BlockSpec((1, dk), lambda i, j: (0, jnp.maximum(j - nd, 0))),
    ]
    out_spec = pl.BlockSpec((bb, dk), lambda i, j: (i, jnp.maximum(j - nd, 0)))

    # VMEM budget from the actual tile footprint (double-buffered streams,
    # single-buffered residents, f32/bf16 scratch), clamped per generation.
    need = (
        2 * bb * dk * 2            # x blocks (bf16)
        + 2 * dk * Hp * 2          # w1 blocks
        + 2 * Hp * dk * 2          # w4 blocks
        + 2 * dk * 4               # b4 blocks
        + 2 * bb * dk * 4          # out blocks (f32)
        + (Hp * Lp + Lp * Hp) * 2  # resident w2, w3
        + (Hp + Lp + Hp) * 4       # resident biases
        + bb * Hp * 4              # acc scratch
        + bb * Hp * 2              # h2 scratch
        + bb * 128 * 4             # sumsq scratch (lane-padded)
    )
    vmem_limit = _vmem_limit_bytes(need)

    out_padded = pl.pallas_call(
        _make_kernel(nd),
        out_shape=jax.ShapeDtypeStruct((Bp, Dp), jnp.float32),
        grid_spec=pltpu.PrefetchScalarGridSpec(
            num_scalar_prefetch=0,
            grid=(Bp // bb, 2 * nd),
            in_specs=in_specs,
            out_specs=out_spec,
            scratch_shapes=[
                pltpu.VMEM((bb, Hp), jnp.float32),   # acc = x @ W1 (unnormalized)
                pltpu.VMEM((bb, 1), jnp.float32),    # per-row sum of squares
                pltpu.VMEM((bb, Hp), jnp.bfloat16),  # decoder hidden h2
            ],
        ),
        compiler_params=pltpu.CompilerParams(
            dimension_semantics=("parallel", "arbitrary"),
            vmem_limit_bytes=vmem_limit,
        ),
    )(xp, w1, b1, w2, b2, w3, b3, w4, b4)

    return out_padded[:B, :D]


# ----------------------------------------------------------------------------
# init + reference
# ----------------------------------------------------------------------------
def init_params(key, input_dim, hidden_dim, latent_dim):
    """Xavier-normal weights, zero biases (matches nn.init.xavier_normal_).
    Weights stored as (fan_in, fan_out) = transpose of PyTorch nn.Linear.weight."""
    def xavier(k, fan_in, fan_out):
        std = (2.0 / (fan_in + fan_out)) ** 0.5
        return std * jax.random.normal(k, (fan_in, fan_out), dtype=jnp.float32)

    k1, k2, k3, k4 = jax.random.split(key, 4)
    return {
        "w1": xavier(k1, input_dim, hidden_dim),
        "b1": jnp.zeros((1, hidden_dim), jnp.float32),
        "w2": xavier(k2, hidden_dim, latent_dim),
        "b2": jnp.zeros((1, latent_dim), jnp.float32),
        "w3": xavier(k3, latent_dim, hidden_dim),
        "b3": jnp.zeros((1, hidden_dim), jnp.float32),
        "w4": xavier(k4, hidden_dim, input_dim),
        "b4": jnp.zeros((1, input_dim), jnp.float32),
    }


def multi_dae_reference(x, params):
    """Pure-JAX f32 reference (same eval-mode semantics)."""
    norm = jnp.sqrt(jnp.sum(x * x, axis=1, keepdims=True))
    xn = x / jnp.maximum(norm, 1e-12)
    h1 = jnp.tanh(xn @ params["w1"] + params["b1"])
    z = jnp.tanh(h1 @ params["w2"] + params["b2"])
    h2 = jnp.tanh(z @ params["w3"] + params["b3"])
    return h2 @ params["w4"] + params["b4"]


if __name__ == "__main__":
    key = jax.random.PRNGKey(0)
    k_x, k_p = jax.random.split(key)

    # Small dims chosen so that (a) the D-streaming path runs with nd=2 K/N
    # steps, (b) batch padding + multiple batch tiles are exercised.
    batch = 300
    input_dim = 512
    hidden_dim = 128
    latent_dim = 64

    x = jax.random.uniform(k_x, (batch, input_dim), dtype=jnp.float32)
    params = init_params(k_p, input_dim, hidden_dim, latent_dim)

    # Weight padding / bf16 cast hoisted out of the forward (done once).
    prepped, meta = prepare_params(params, block_d=256)

    out = multi_dae_forward(x, prepped, meta, block_batch=256)
    out = jax.block_until_ready(out)

    ref = multi_dae_reference(x, params)
    assert out.shape == (batch, input_dim)
    max_err = float(jnp.max(jnp.abs(out - ref)))
    # bf16 MXU inputs / bf16 x streaming with f32 accumulation -> loosened tol.
    assert jnp.allclose(out, ref, atol=1e-2, rtol=1e-2), (
        "mismatch vs reference; max abs err = %g" % max_err)

    print("KERNEL_OK")
</pallas_src>

<mosaic_0001>
module attributes {stable_mosaic.version = 11 : i64} {
  func.func @kernel(%arg0: i32, %arg1: i32, %arg2: memref<152x256xbf16, #tpu.memory_space<vmem>>, %arg3: memref<256x128xbf16, #tpu.memory_space<vmem>>, %arg4: memref<1x128xf32, #tpu.memory_space<vmem>>, %arg5: memref<128x128xbf16, #tpu.memory_space<vmem>>, %arg6: memref<1x128xf32, #tpu.memory_space<vmem>>, %arg7: memref<128x128xbf16, #tpu.memory_space<vmem>>, %arg8: memref<1x128xf32, #tpu.memory_space<vmem>>, %arg9: memref<128x256xbf16, #tpu.memory_space<vmem>>, %arg10: memref<1x256xf32, #tpu.memory_space<vmem>>, %arg11: memref<152x256xf32, #tpu.memory_space<vmem>>, %arg12: memref<152x128xf32, #tpu.memory_space<vmem>>, %arg13: memref<152x1xf32, #tpu.memory_space<vmem>>, %arg14: memref<152x128xbf16, #tpu.memory_space<vmem>>) attributes {dimension_semantics = [#tpu.dimension_semantics<parallel>, #tpu.dimension_semantics<arbitrary>], iteration_bounds = array<i64: 2, 4>, scalar_prefetch = 0 : i64, scratch_operands = 3 : i64, tpu.core_type = #tpu.core_type<tc>, window_params = [{transform_indices = @transform_0, window_bounds = array<i64: 152, 256>}, {transform_indices = @transform_1, window_bounds = array<i64: 256, 128>}, {pipeline_mode = #tpu.pipeline_mode<synchronous>, transform_indices = @transform_2, window_bounds = array<i64: 1, 128>}, {pipeline_mode = #tpu.pipeline_mode<synchronous>, transform_indices = @transform_3, window_bounds = array<i64: 128, 128>}, {pipeline_mode = #tpu.pipeline_mode<synchronous>, transform_indices = @transform_4, window_bounds = array<i64: 1, 128>}, {pipeline_mode = #tpu.pipeline_mode<synchronous>, transform_indices = @transform_5, window_bounds = array<i64: 128, 128>}, {pipeline_mode = #tpu.pipeline_mode<synchronous>, transform_indices = @transform_6, window_bounds = array<i64: 1, 128>}, {transform_indices = @transform_7, window_bounds = array<i64: 128, 256>}, {transform_indices = @transform_8, window_bounds = array<i64: 1, 256>}, {transform_indices = @transform_9, window_bounds = array<i64: 152, 256>}]} {
    %c0_i32 = arith.constant 0 : i32
    %0 = arith.cmpi eq, %arg1, %c0_i32 : i32
    %1 = arith.extui %0 : i1 to i32
    %c0_i32_0 = arith.constant 0 : i32
    %2 = arith.cmpi ne, %1, %c0_i32_0 : i32
    scf.if %2 {
      %cst = arith.constant 0.000000e+00 : f32
      %12 = vector.broadcast %cst : f32 to vector<152x128xf32>
      %c0 = arith.constant 0 : index
      %c0_5 = arith.constant 0 : index
      %13 = vector.load %arg12[%c0, %c0_5] : memref<152x128xf32, #tpu.memory_space<vmem>>, vector<152x128xf32>
      tpu.vector_store %arg12[%c0, %c0_5], %12 {strides = array<i32>} : memref<152x128xf32, #tpu.memory_space<vmem>>, vector<152x128xf32>,
      %cst_6 = arith.constant 0.000000e+00 : f32
      %14 = vector.broadcast %cst_6 : f32 to vector<152x1xf32>
      %c0_7 = arith.constant 0 : index
      %c0_8 = arith.constant 0 : index
      %15 = vector.load %arg13[%c0_7, %c0_8] : memref<152x1xf32, #tpu.memory_space<vmem>>, vector<152x1xf32>
      tpu.vector_store %arg13[%c0_7, %c0_8], %14 {strides = array<i32>} : memref<152x1xf32, #tpu.memory_space<vmem>>, vector<152x1xf32>,
    } else {
    }
    %c2_i32 = arith.constant 2 : i32
    %3 = arith.cmpi slt, %arg1, %c2_i32 : i32
    %4 = arith.extui %3 : i1 to i32
    %c0_i32_1 = arith.constant 0 : i32
    %5 = arith.cmpi ne, %4, %c0_i32_1 : i32
    scf.if %5 {
      %c0 = arith.constant 0 : index
      %c0_5 = arith.constant 0 : index
      %12 = vector.load %arg2[%c0, %c0_5] : memref<152x256xbf16, #tpu.memory_space<vmem>>, vector<152x256xbf16>
      %13 = arith.extf %12 : vector<152x256xbf16> to vector<152x256xf32>
      %c0_6 = arith.constant 0 : index
      %c0_7 = arith.constant 0 : index
      %14 = vector.load %arg13[%c0_6, %c0_7] : memref<152x1xf32, #tpu.memory_space<vmem>>, vector<152x1xf32>
      %15 = arith.mulf %13, %13 : vector<152x256xf32>
      %cst = arith.constant dense<0.000000e+00> : vector<152xf32>
      %16 = vector.multi_reduction <add>, %15, %cst [1] : vector<152x256xf32> to vector<152xf32>
      %17 = vector.shape_cast %16 : vector<152xf32> to vector<152x1xf32>
      %18 = arith.addf %14, %17 : vector<152x1xf32>
      %c0_8 = arith.constant 0 : index
      %c0_9 = arith.constant 0 : index
      %19 = vector.load %arg13[%c0_8, %c0_9] : memref<152x1xf32, #tpu.memory_space<vmem>>, vector<152x1xf32>
      tpu.vector_store %arg13[%c0_8, %c0_9], %18 {strides = array<i32>} : memref<152x1xf32, #tpu.memory_space<vmem>>, vector<152x1xf32>,
      %c0_10 = arith.constant 0 : index
      %c0_11 = arith.constant 0 : index
      %20 = vector.load %arg12[%c0_10, %c0_11] : memref<152x128xf32, #tpu.memory_space<vmem>>, vector<152x128xf32>
      %c0_12 = arith.constant 0 : index
      %c0_13 = arith.constant 0 : index
      %21 = vector.load %arg3[%c0_12, %c0_13] : memref<256x128xbf16, #tpu.memory_space<vmem>>, vector<256x128xbf16>
      %cst_14 = arith.constant dense<0.000000e+00> : vector<152x128xf32>
      %22 = tpu.matmul %12, %21, %cst_14 {dimension_numbers = #tpu.dot_dimension_numbers<[1], [0], [0], [1], [0, 0, 1, 1], [], []>} : vector<152x256xbf16>, vector<256x128xbf16>, vector<152x128xf32> -> vector<152x128xf32>
      %23 = arith.addf %20, %22 : vector<152x128xf32>
      %c0_15 = arith.constant 0 : index
      %c0_16 = arith.constant 0 : index
      %24 = vector.load %arg12[%c0_15, %c0_16] : memref<152x128xf32, #tpu.memory_space<vmem>>, vector<152x128xf32>
      tpu.vector_store %arg12[%c0_15, %c0_16], %23 {strides = array<i32>} : memref<152x128xf32, #tpu.memory_space<vmem>>, vector<152x128xf32>,
    } else {
    }
    %c1_i32 = arith.constant 1 : i32
    %6 = arith.cmpi eq, %arg1, %c1_i32 : i32
    %7 = arith.extui %6 : i1 to i32
    %c0_i32_2 = arith.constant 0 : i32
    %8 = arith.cmpi ne, %7, %c0_i32_2 : i32
    scf.if %8 {
      %c0 = arith.constant 0 : index
      %c0_5 = arith.constant 0 : index
      %12 = vector.load %arg13[%c0, %c0_5] : memref<152x1xf32, #tpu.memory_space<vmem>>, vector<152x1xf32>
      %cst = arith.constant 1.000000e-24 : f32
      %13 = vector.broadcast %cst : f32 to vector<152x1xf32>
      %14 = arith.maximumf %12, %13 : vector<152x1xf32>
      %15 = math.rsqrt %14 : vector<152x1xf32>
      %c0_6 = arith.constant 0 : index
      %c0_7 = arith.constant 0 : index
      %16 = vector.load %arg12[%c0_6, %c0_7] : memref<152x128xf32, #tpu.memory_space<vmem>>, vector<152x128xf32>
      %17 = vector.broadcast %15 : vector<152x1xf32> to vector<152x128xf32>
      %18 = arith.mulf %16, %17 : vector<152x128xf32>
      %c0_8 = arith.constant 0 : index
      %c0_9 = arith.constant 0 : index
      %19 = vector.load %arg4[%c0_8, %c0_9] : memref<1x128xf32, #tpu.memory_space<vmem>>, vector<1x128xf32>
      %20 = vector.broadcast %19 : vector<1x128xf32> to vector<152x128xf32>
      %21 = arith.addf %18, %20 : vector<152x128xf32>
      %22 = arith.truncf %21 : vector<152x128xf32> to vector<152x128xbf16>
      %23 = math.tanh %22 : vector<152x128xbf16>
      %c0_10 = arith.constant 0 : index
      %c0_11 = arith.constant 0 : index
      %24 = vector.load %arg5[%c0_10, %c0_11] : memref<128x128xbf16, #tpu.memory_space<vmem>>, vector<128x128xbf16>
      %cst_12 = arith.constant dense<0.000000e+00> : vector<152x128xf32>
      %25 = tpu.matmul %23, %24, %cst_12 {dimension_numbers = #tpu.dot_dimension_numbers<[1], [0], [0], [1], [0, 0, 1, 1], [], []>} : vector<152x128xbf16>, vector<128x128xbf16>, vector<152x128xf32> -> vector<152x128xf32>
      %c0_13 = arith.constant 0 : index
      %c0_14 = arith.constant 0 : index
      %26 = vector.load %arg6[%c0_13, %c0_14] : memref<1x128xf32, #tpu.memory_space<vmem>>, vector<1x128xf32>
      %27 = vector.broadcast %26 : vector<1x128xf32> to vector<152x128xf32>
      %28 = arith.addf %25, %27 : vector<152x128xf32>
      %29 = arith.truncf %28 : vector<152x128xf32> to vector<152x128xbf16>
      %30 = math.tanh %29 : vector<152x128xbf16>
      %c0_15 = arith.constant 0 : index
      %c0_16 = arith.constant 0 : index
      %31 = vector.load %arg7[%c0_15, %c0_16] : memref<128x128xbf16, #tpu.memory_space<vmem>>, vector<128x128xbf16>
      %cst_17 = arith.constant dense<0.000000e+00> : vector<152x128xf32>
      %32 = tpu.matmul %30, %31, %cst_17 {dimension_numbers = #tpu.dot_dimension_numbers<[1], [0], [0], [1], [0, 0, 1, 1], [], []>} : vector<152x128xbf16>, vector<128x128xbf16>, vector<152x128xf32> -> vector<152x128xf32>
      %c0_18 = arith.constant 0 : index
      %c0_19 = arith.constant 0 : index
      %33 = vector.load %arg8[%c0_18, %c0_19] : memref<1x128xf32, #tpu.memory_space<vmem>>, vector<1x128xf32>
      %34 = vector.broadcast %33 : vector<1x128xf32> to vector<152x128xf32>
      %35 = arith.addf %32, %34 : vector<152x128xf32>
      %36 = arith.truncf %35 : vector<152x128xf32> to vector<152x128xbf16>
      %37 = math.tanh %36 : vector<152x128xbf16>
      %c0_20 = arith.constant 0 : index
      %c0_21 = arith.constant 0 : index
      %38 = vector.load %arg14[%c0_20, %c0_21] : memref<152x128xbf16, #tpu.memory_space<vmem>>, vector<152x128xbf16>
      tpu.vector_store %arg14[%c0_20, %c0_21], %37 {strides = array<i32>} : memref<152x128xbf16, #tpu.memory_space<vmem>>, vector<152x128xbf16>,
    } else {
    }
    %c2_i32_3 = arith.constant 2 : i32
    %9 = arith.cmpi sge, %arg1, %c2_i32_3 : i32
    %10 = arith.extui %9 : i1 to i32
    %c0_i32_4 = arith.constant 0 : i32
    %11 = arith.cmpi ne, %10, %c0_i32_4 : i32
    scf.if %11 {
      %c0 = arith.constant 0 : index
      %c0_5 = arith.constant 0 : index
      %12 = vector.load %arg14[%c0, %c0_5] : memref<152x128xbf16, #tpu.memory_space<vmem>>, vector<152x128xbf16>
      %c0_6 = arith.constant 0 : index
      %c0_7 = arith.constant 0 : index
      %13 = vector.load %arg9[%c0_6, %c0_7] : memref<128x256xbf16, #tpu.memory_space<vmem>>, vector<128x256xbf16>
      %cst = arith.constant dense<0.000000e+00> : vector<152x256xf32>
      %14 = tpu.matmul %12, %13, %cst {dimension_numbers = #tpu.dot_dimension_numbers<[1], [0], [0], [1], [0, 0, 1, 1], [], []>} : vector<152x128xbf16>, vector<128x256xbf16>, vector<152x256xf32> -> vector<152x256xf32>
      %c0_8 = arith.constant 0 : index
      %c0_9 = arith.constant 0 : index
      %15 = vector.load %arg10[%c0_8, %c0_9] : memref<1x256xf32, #tpu.memory_space<vmem>>, vector<1x256xf32>
      %16 = vector.broadcast %15 : vector<1x256xf32> to vector<152x256xf32>
      %17 = arith.addf %14, %16 : vector<152x256xf32>
      %c0_10 = arith.constant 0 : index
      %c0_11 = arith.constant 0 : index
      %18 = vector.load %arg11[%c0_10, %c0_11] : memref<152x256xf32, #tpu.memory_space<vmem>>, vector<152x256xf32>
      tpu.vector_store %arg11[%c0_10, %c0_11], %17 {strides = array<i32>} : memref<152x256xf32, #tpu.memory_space<vmem>>, vector<152x256xf32>,
    } else {
    }
    return
  }
  func.func @transform_0(%arg0: i32, %arg1: i32) -> (i32, i32) {
    %c1_i32 = arith.constant 1 : i32
    %0 = arith.minsi %arg1, %c1_i32 : i32
    %c0_i32 = arith.constant 0 : i32
    return %arg0, %0 : i32, i32
  }
  func.func @transform_1(%arg0: i32, %arg1: i32) -> (i32, i32) {
    %c1_i32 = arith.constant 1 : i32
    %0 = arith.minsi %arg1, %c1_i32 : i32
    %c0_i32 = arith.constant 0 : i32
    %c0_i32_0 = arith.constant 0 : i32
    return %0, %c0_i32 : i32, i32
  }
  func.func @transform_2(%arg0: i32, %arg1: i32) -> (i32, i32) {
    %c0_i32 = arith.constant 0 : i32
    %c0_i32_0 = arith.constant 0 : i32
    %c0_i32_1 = arith.constant 0 : i32
    return %c0_i32, %c0_i32_0 : i32, i32
  }
  func.func @transform_3(%arg0: i32, %arg1: i32) -> (i32, i32) {
    %c0_i32 = arith.constant 0 : i32
    %c0_i32_0 = arith.constant 0 : i32
    %c0_i32_1 = arith.constant 0 : i32
    return %c0_i32, %c0_i32_0 : i32, i32
  }
  func.func @transform_4(%arg0: i32, %arg1: i32) -> (i32, i32) {
    %c0_i32 = arith.constant 0 : i32
    %c0_i32_0 = arith.constant 0 : i32
    %c0_i32_1 = arith.constant 0 : i32
    return %c0_i32, %c0_i32_0 : i32, i32
  }
  func.func @transform_5(%arg0: i32, %arg1: i32) -> (i32, i32) {
    %c0_i32 = arith.constant 0 : i32
    %c0_i32_0 = arith.constant 0 : i32
    %c0_i32_1 = arith.constant 0 : i32
    return %c0_i32, %c0_i32_0 : i32, i32
  }
  func.func @transform_6(%arg0: i32, %arg1: i32) -> (i32, i32) {
    %c0_i32 = arith.constant 0 : i32
    %c0_i32_0 = arith.constant 0 : i32
    %c0_i32_1 = arith.constant 0 : i32
    return %c0_i32, %c0_i32_0 : i32, i32
  }
  func.func @transform_7(%arg0: i32, %arg1: i32) -> (i32, i32) {
    %c2_i32 = arith.constant 2 : i32
    %0 = arith.subi %arg1, %c2_i32 : i32
    %c0_i32 = arith.constant 0 : i32
    %1 = arith.maxsi %0, %c0_i32 : i32
    %c0_i32_0 = arith.constant 0 : i32
    %c0_i32_1 = arith.constant 0 : i32
    return %c0_i32_0, %1 : i32, i32
  }
  func.func @transform_8(%arg0: i32, %arg1: i32) -> (i32, i32) {
    %c2_i32 = arith.constant 2 : i32
    %0 = arith.subi %arg1, %c2_i32 : i32
    %c0_i32 = arith.constant 0 : i32
    %1 = arith.maxsi %0, %c0_i32 : i32
    %c0_i32_0 = arith.constant 0 : i32
    %c0_i32_1 = arith.constant 0 : i32
    return %c0_i32_0, %1 : i32, i32
  }
  func.func @transform_9(%arg0: i32, %arg1: i32) -> (i32, i32) {
    %c2_i32 = arith.constant 2 : i32
    %0 = arith.subi %arg1, %c2_i32 : i32
    %c0_i32 = arith.constant 0 : i32
    %1 = arith.maxsi %0, %c0_i32 : i32
    %c0_i32_0 = arith.constant 0 : i32
    return %arg0, %1 : i32, i32
  }
}

</mosaic_0001>

<bundles_post_ra>
// kernel: tpu_custom_call.1
= control target key start
LH: loop header
LB: loop body
LE: loop exit
PB: predicated region body
PF: predicated region fallthrough
CT: control target
= control target key end

     0   :  { %s4507_s0 = inlined_call_operand.hbm [shape: bf16[304,512], index: 0, kind: input, shape index: {}]   ;;  %s4508_s1 = inlined_call_operand.hbm [shape: bf16[512,128], index: 1, kind: input, shape index: {}]   ;;  %s4509_s2 = inlined_call_operand.vmem [shape: f32[1,128], index: 2, kind: input, shape index: {}]   ;;  %s4510_s3 = inlined_call_operand.hbm [shape: bf16[128,128], index: 3, kind: input, shape index: {}]   ;;  %s4511_s4 = inlined_call_operand.vmem [shape: f32[1,128], index: 4, kind: input, shape index: {}]   ;;  %s4512_s5 = inlined_call_operand.hbm [shape: bf16[128,128], index: 5, kind: input, shape index: {}]   ;;  %s4513_s6 = inlined_call_operand.vmem [shape: f32[1,128], index: 6, kind: input, shape index: {}]   ;;  %s4514_s7 = inlined_call_operand.hbm [shape: bf16[128,512], index: 7, kind: input, shape index: {}]   ;;  %s4515_s8 = inlined_call_operand.vmem [shape: f32[1,512], index: 8, kind: input, shape index: {}]   ;;  %s4516_s9 = inlined_call_operand.hbm [shape: f32[304,512], index: 9, kind: output, shape index: {}]  }
   0x1   :  { %4550 = sst [smem:[#allocation35_spill]] %s4507_s0 }
   0x2   :  { %4551 = sst [smem:[#allocation36_spill]] %s4508_s1 }
   0x3   :  { %4552 = sst [smem:[#allocation37_spill]] %s4509_s2 }
   0x4   :  { %4553 = sst [smem:[#allocation38_spill]] %s4510_s3 }
   0x5   :  { %4554 = sst [smem:[#allocation39_spill]] %s4511_s4 }
   0x6   :  { %4555 = sst [smem:[#allocation40_spill]] %s4512_s5 }
   0x7   :  { %4556 = sst [smem:[#allocation41_spill]] %s4513_s6 }
   0x8   :  { %4557 = sst [smem:[#allocation42_spill]] %s4514_s7 }
   0x9   :  { %4558 = sst [smem:[#allocation43_spill]] %s4515_s8 }
   0xa   :  { %4559 = sst [smem:[#allocation44_spill]] %s4516_s9 }
   0xb   :  { %14 = vsyncpa [#allocation6], 0 }
   0xc   :  { %16 = vsyncpa [#allocation6 + $0x1], 0 }
   0xd   :  { %17 = vsyncpa [#allocation9], 0 }
   0xe   :  { %19 = vsyncpa [#allocation9 + $0x1], 0 }
   0xf   :  { %20 = vsyncpa [#allocation12], 0 }
  0x10   :  { %21 = vsyncpa [#allocation7], 0 }
  0x11   :  { %23 = vsyncpa [#allocation7 + $0x1], 0  ;;  %s3623_s30 = smov 0   ;;  %s3625_s10 = smov 0  }
  0x12   :  { %s3627_s11 = smov 0   ;;  %s3629_s12 = smov 0  }
  0x13   :  { %s3631_s13 = smov 0   ;;  %s3633_s14 = smov 0  }
  0x14   :  { %s3635_s15 = smov 0   ;;  %s3637_s16 = smov 0  }
  0x15   :  { %s3639_s17 = smov 0   ;;  %s3641_s18 = smov 0  }
  0x16   :  { %s3643_s19 = smov 0   ;;  %s3645_s20 = smov 0  }
  0x17   :  { %s3647_s21 = smov 0   ;;  %s3649_s22 = smov 0  }
  0x18   :  { %s3651_s23 = smov 0   ;;  %s3653_s24 = smov 0  }
  0x19   :  { %s3655_s25 = smov 0  }
  0x1a LB: > { %4560 = sst [smem:[#allocation21_spill]] %s3490_s30  ;;  %s3707_s26 = sadd.s32 4294967295, %s3554_s25   ;;  %s3554_s25 = sphi %s3655_s25, %s29_s25   ;;  %s3550_s24 = sphi %s3653_s24, %s4657_s24   ;;  %s3546_s23 = sphi %s3651_s23, %s4656_s23   ;;  %s3542_s22 = sphi %s3649_s22, %s4655_s22   ;;  %s3538_s21 = sphi %s3647_s21, %s4654_s21   ;;  %s3534_s20 = sphi %s3645_s20, %s4653_s20   ;;  %s3530_s19 = sphi %s3643_s19, %s4652_s19   ;;  %s3526_s18 = sphi %s3641_s18, %s4639_s18   ;;  %s3522_s17 = sphi %s3639_s17, %s4651_s17   ;;  %s3518_s16 = sphi %s3637_s16, %s4650_s16   ;;  %s3514_s15 = sphi %s3635_s15, %s4649_s15   ;;  %s3510_s14 = sphi %s3633_s14, %s4648_s14   ;;  %s3506_s13 = sphi %s3631_s13, %s4647_s13   ;;  %s3502_s12 = sphi %s3629_s12, %s4646_s12   ;;  %s3498_s11 = sphi %s3627_s11, %s4645_s11   ;;  %s3494_s10 = sphi %s3625_s10, %s4643_s10   ;;  %s3490_s30 = sphi %s3623_s30, %s4638_s30  }
  0x1b   : > { %4561 = sst [smem:[#allocation22_spill]] %s3494_s10  ;;  %s2483_s27 = sadd.s32 4294967294, %s3554_s25  }
  0x1c   : > { %4562 = sst [smem:[#allocation23_spill]] %s3530_s19  ;;  %p4522_p0 = scmp.eq.s32.totalorder %s3707_s26, 0 }
  0x1d   : > { %4563 = sst [smem:[#allocation24_spill]] %s3538_s21  ;;  %p234_p1 = scmp.ne.s32.totalorder %s3506_s13, %s3502_s12 }
  0x1e   : > { %4564 = sst [smem:[#allocation25_spill]] %s3542_s22  ;;  %p297_p2 = scmp.ne.s32.totalorder %s3498_s11, %s3494_s10 }
  0x1f   : > { %4565 = sst [smem:[#allocation26_spill]] %s3550_s24  ;;  %p298_p3 = scmp.eq.s32.totalorder %s3707_s26, 7 }
  0x20   : > { %p3717_p4 = por %p234_p1, %p4522_p0  ;;  %p303_p5 = scmp.ne.s32.totalorder %s3494_s10, %s3490_s30 }
  0x21   : > { %p3723_p6 = por %p298_p3, %p297_p2  ;;  %p304_p7 = scmp.eq.s32.totalorder %s2483_s27, 7 }
  0x22   : > { %s4566_s28 = scalar_select %p3717_p4, 1, 0 }
  0x23   : > { %s4568_s29 = scalar_select %p3723_p6, 1, 0 }
  0x24   : > { %4567 = sst [smem:[#allocation27_spill]] %s4566_s28  ;;  %p2490_p8 = scmp.ge.s32.totalorder %s3554_s25, 1 }
  0x25   : > { %4569 = sst [smem:[#allocation28_spill]] %s4568_s29  ;;  %p311_p9 = scmp.lt.s32.totalorder %s3554_s25, 9 }
  0x26   : > { %p3729_p10 = por %p304_p7, %p303_p5  ;;  %s3556_s22 = smov [#allocation10]  }
  0x27   : > { %p3733_p11 = pnand %p2490_p8, %p311_p9  ;;  %s326_s6 = sshll.u32 %s3556_s22, 4  ;;  %s327_s6 = int_to_ptr.vmem [resolvable:$true] %s326_s6 }
  0x28   : > { %s4570_s9 = scalar_select %p3729_p10, 1, 0 }
  0x29   : > { %s4572_s12 = scalar_select %p3733_p11, 1, 0 }
  0x2a   : > { %4571 = sst [smem:[#allocation29_spill]] %s4570_s9  ;;  %p2860_p12 = pneg %p3733_p11 }
  0x2b   : > { %4573 = sst [smem:[#allocation30_spill]] %s4572_s12  ;;  %s4575_s3 = sld [smem:[#allocation38_spill]] }
  0x2c   : > { %p3741_p13 = pnand %p2860_p12, %p4522_p0 }
  0x2e   : > { %p4545_p2 = pneg %p3741_p13 }
  0x31   : > { %s3222_s9 = scalar_lea.hbm %s4575_s3, 1024 }
  0x32   : > { %p3223_p1 = scmp.ne.s32.totalorder %s4575_s3, %s3222_s9  ;;  %p3229_p7 = scmp.lt.u32.totalorder %s3222_s9, %s4575_s3 }
  0x34   : > { %p3225_p3 = pnand %p4545_p2, %p3223_p1 }
  0x36   : > { %p3226_p5 = pneg %p3225_p3 }
  0x38   : > { %p3231_p8 = pnand %p3229_p7, %p3226_p5 }
  0x3a   : > { %3234 = shalt.err (!%p3231_p8)
}
  0x3b   : > { %s3235_s29 = scalar_lea.vmem %s327_s6, 1024  ;;  %p3243_p10 = scmp.lt.s32.totalorder %s327_s6, %s327_s6 }
  0x3c   : > { %p3236_p9 = scmp.ne.s32.totalorder %s327_s6, %s3235_s29  ;;  %p3244_p6 = scmp.lt.s32.totalorder %s3235_s29, %s3235_s29 }
  0x3e   : > { %p3238_p12 = pnand %p3236_p9, %p4545_p2  ;;  %p3245_p4 = por %p3244_p6, %p3243_p10 }
  0x40   : > { %p3239_p0 = pneg %p3238_p12 }
  0x42   : > { %p3246_p11 = pnand %p3245_p4, %p3239_p0 }
  0x44   : > { %3249 = shalt.err (!%p3246_p11)
}
  0x45   : > { %s4527_s2 = smov 64   ;;  %s4529_s4 = smov 4  }
  0x46   : > { %2863 = dma.hbm_to_vmem [thread:$0]  (!%p3741_p13), %s4575_s3, 1024, %s327_s6, [#allocation9], %s4527_s2, %s4527_s2, %s4529_s4  }
  0x47   : > { %s38_s27 = sadd.s32 1, %s3546_s23  ;;  %s41_s22 = sadd.s32 1, %s3550_s24 }
  0x48   : > { %p39_p0 = scmp.ge.s32.totalorder %s38_s27, 4  ;;  %p45_p4 = scmp.lt.s32.totalorder %s3546_s23, 1 }
  0x49   : > { %s54_s29 = sadd.s32 1, %s3534_s20  ;;  %p61_p6 = scmp.ne.s32.totalorder %s3534_s20, %s3530_s19 }
  0x4a   : > { %s4659_s27 = smov (%p39_p0, %s38_s27), 0  ;;  %s4661_s22 = smov (!%p39_p0, %s41_s22), %s3550_s24 }
  0x4b   : > { %s3780_s21 = scalar_select %p45_p4, %s3546_s23, 1 }
  0x4c   : > { %p43_p10 = scmp.ge.s32.totalorder %s4661_s22, 2  ;;  %p47_p11 = scmp.lt.s32.totalorder %s4659_s27, 1 }
  0x4d   : > { %p4544_p1 = scmp.eq.s32.totalorder %s3554_s25, 0  ;;  %p67_p3 = scmp.ne.s32.totalorder %s3530_s19, %s3526_s18 }
  0x4e   : > { %s4663_s22 = smov (%p43_p10, %s4661_s22), 0  ;;  %p4579_p7 = scmp.eq.s32.totalorder %s3707_s26, 0 }
  0x4f   : > { %4576 = sst [smem:[#allocation31_spill]] %s4663_s22  ;;  %s3791_s8 = ssub.s32 %s3550_s24, %s4663_s22 }
  0x50   : > { %s48_s6 = scalar_select %p47_p11, %s4659_s27, 1 }
  0x51   : > { %4577 = sst [smem:[#allocation32_spill]] %s3791_s8  ;;  %p3795_p5 = por %p4544_p1, %p61_p6 }
  0x52   : > { %s3800_s2 = ssub.s32 %s3780_s21, %s48_s6  ;;  %p3804_p8 = por %p4579_p7, %p67_p3 }
  0x53   : > { %s51_s4 = sor.u32 %s3800_s2, %s3791_s8  ;;  %p4543_p0 = scmp.lt.s32.totalorder %s3554_s25, 8 }
  0x54   : > { %s4580_s18 = scalar_select %p3804_p8, 1, 0 }
  0x55   : > { %p52_p12 = scmp.eq.s32.totalorder %s51_s4, 0  ;;  %s361_s22 = sand.u32 1, %s3534_s20  }
  0x56   : > { %4581 = sst [smem:[#allocation33_spill]] %s4580_s18  ;;  %s2841_s28 = smul.u32 152, %s361_s22 }
  0x57   : > { %s3815_s10 = scalar_select %p52_p12, %s3534_s20, %s54_s29  }
  0x58   : > { %s2494_s19 = sshll.u32 %s3780_s21, 1  ;;  %s2621_s6 = smul.u32 76, %s3550_s24 }
  0x59   : > { %4582 = sst [smem:[#allocation34_spill]] %s3815_s10  ;;  %p3823_p4 = pnand %p4543_p0, %p3795_p5 }
  0x5a   : > { %s372_s18 = sadd.s32 %s2621_s6, %s2494_s19  ;;  %s363_s7 = scalar_lea.vmem [#allocation5], %s2841_s28 }
  0x5b   : > { %s375_s8 = sshll.u32 %s363_s7, 4  ;;  %s2496_s4 = sshll.u32 %s372_s18, 6  ;;  %s3827_s8 = int_to_ptr.vmem [resolvable:$true] %s375_s8 }
  0x5c   : > { %s4584_s0 = sld [smem:[#allocation35_spill]]  ;;  %s4585_s24 = sand.u32 1, %s3554_s25  }
  0x5d   : > { %s3836_s9 = scalar_lea.sflag [#allocation6], %s4585_s24  ;;  %p3252_p10 = pneg %p3823_p4 }
  0x62   : > { %s3832_s22 = scalar_lea.hbm %s4584_s0, %s2496_s4  ;;  %s3255_s3 = scalar_lea.hbm %s4584_s0, 9728 }
  0x63   : > { %s3250_s10 = scalar_lea.hbm %s3832_s22, 2432  ;;  %p3256_p5 = scmp.lt.u32.totalorder %s3832_s22, %s4584_s0 }
  0x64   : > { %p3251_p6 = scmp.ne.s32.totalorder %s3832_s22, %s3250_s10  ;;  %p3257_p7 = scmp.lt.u32.totalorder %s3255_s3, %s3250_s10 }
  0x65   : > { %p3259_p0 = scmp.lt.u32.totalorder %s3250_s10, %s3832_s22 }
  0x66   : > { %p3253_p11 = pnand %p3252_p10, %p3251_p6  ;;  %p3258_p12 = por %p3257_p7, %p3256_p5 }
  0x68   : > { %p3254_p3 = pneg %p3253_p11  ;;  %p3260_p1 = por %p3259_p0, %p3258_p12 }
  0x6a   : > { %p3261_p9 = pnand %p3260_p1, %p3254_p3 }
  0x6c   : > { %3264 = shalt.err (!%p3261_p9)
}
  0x6d   : > { %s3265_s24 = scalar_lea.vmem %s3827_s8, 2432  ;;  %s3559_s6 = smov [#allocation5]  }
  0x6e   : > { %p3266_p6 = scmp.ne.s32.totalorder %s3827_s8, %s3265_s24  ;;  %s3270_s4 = sshll.u32 %s3559_s6, 4  ;;  %s3271_s4 = int_to_ptr.vmem [resolvable:$false] %s3270_s4 }
  0x6f   : > { %s3272_s29 = scalar_lea.vmem %s3271_s4, 4864  ;;  %p3273_p8 = scmp.lt.s32.totalorder %s3827_s8, %s3271_s4 }
  0x70   : > { %p3268_p11 = pnand %p3266_p6, %p3252_p10  ;;  %p3274_p5 = scmp.lt.s32.totalorder %s3272_s29, %s3265_s24 }
  0x72   : > { %p3269_p2 = pneg %p3268_p11  ;;  %p3275_p7 = por %p3274_p5, %p3273_p8 }
  0x74   : > { %p3276_p0 = pnand %p3275_p7, %p3269_p2 }
  0x76   : > { %3279 = shalt.err (!%p3276_p0)
}
  0x77   : > { %s4547_s10 = smov 256   ;;  %s4548_s7 = smov 128  }
  0x78   : > { %s4549_s19 = smov 8   ;;  %s3563_s3 = smov [#allocation11]  }
  0x79   : > { %2870 = dma.hbm_to_vmem [thread:$0]  (!%p3823_p4), %s3832_s22, 2432, %s3827_s8, %s3836_s9, %s4547_s10, %s4548_s7, %s4549_s19  }
  0x7a   : > { %s342_s28 = sshll.u32 %s3563_s3, 4  ;;  %s4586_s5 = sld [smem:[#allocation40_spill]]  ;;  %s343_s28 = int_to_ptr.vmem [resolvable:$true] %s342_s28 }
  0x7b   : > { %p4587_p1 = pneg %p3741_p13 }
  0x80   : > { %s3280_s6 = scalar_lea.hbm %s4586_s5, 1024 }
  0x81   : > { %p3281_p2 = scmp.ne.s32.totalorder %s4586_s5, %s3280_s6  ;;  %p3287_p10 = scmp.lt.u32.totalorder %s3280_s6, %s4586_s5 }
  0x83   : > { %p3283_p8 = pnand %p3281_p2, %p4587_p1 }
  0x85   : > { %p3284_p9 = pneg %p3283_p8 }
  0x87   : > { %p3289_p4 = pnand %p3287_p10, %p3284_p9 }
  0x89   : > { %3292 = shalt.err (!%p3289_p4)
}
  0x8a   : > { %s3293_s8 = scalar_lea.vmem %s343_s28, 1024  ;;  %p4588_p12 = pmov %p4587_p1 }
  0x8b   : > { %p3294_p3 = scmp.ne.s32.totalorder %s343_s28, %s3293_s8  ;;  %p3301_p5 = scmp.lt.s32.totalorder %s343_s28, %s343_s28 }
  0x8c   : > { %p3302_p7 = scmp.lt.s32.totalorder %s3293_s8, %s3293_s8 }
  0x8d   : > { %p3296_p6 = pnand %p3294_p3, %p4588_p12 }
  0x8e   : > { %p3303_p0 = por %p3302_p7, %p3301_p5 }
  0x8f   : > { %p3297_p11 = pneg %p3296_p6 }
  0x91   : > { %p3304_p1 = pnand %p3303_p0, %p3297_p11 }
  0x93   : > { %3307 = shalt.err (!%p3304_p1)
}
  0x94   : > { %s4589_s22 = smov 4   ;;  %s4590_s3 = smov 64  }
  0x95   : > { %2866 = dma.hbm_to_vmem [thread:$0]  (!%p3741_p13), %s4586_s5, 1024, %s343_s28, [#allocation12], %s4590_s3, %s4590_s3, %s4589_s22  }
  0x96   : > { %s84_s30 = sadd.s32 1, %s3522_s17  ;;  %p91_p2 = scmp.ne.s32.totalorder %s3522_s17, %s3518_s16 }
  0x97   : > { %p4591_p8 = scmp.eq.s32.totalorder %s3800_s2, 0  ;;  %p4592_p9 = scmp.eq.s32.totalorder %s3554_s25, 0 }
  0x98   : > { %p97_p4 = scmp.ne.s32.totalorder %s3518_s16, %s3514_s15  ;;  %s387_s6 = sand.u32 1, %s3522_s17  }
  0x99   : > { %s3896_s24 = scalar_select %p4591_p8, %s3522_s17, %s84_s30  }
  0x9a   : > { %p93_p10 = por %p91_p2, %p4592_p9  ;;  %p4593_p3 = scmp.eq.s32.totalorder %s3707_s26, 0 }
  0x9b   : > { %s2497_s29 = sshll.u32 %s387_s6, 7  ;;  %s2622_s12 = sshll.u32 %s3780_s21, 11 }
  0x9c   : > { %p3905_p12 = por %p97_p4, %p4593_p3  ;;  %s4595_s1 = sld [smem:[#allocation36_spill]] }
  0x9d   : > { %s389_s2 = scalar_lea.vmem [#allocation8], %s2497_s29  ;;  %p4596_p13 = scmp.lt.s32.totalorder %s3554_s25, 8 }
  0x9e   : > { %s398_s18 = sshll.u32 %s389_s2, 4  ;;  %s2484_s21 = sadd.s32 4294967294, %s3546_s23  ;;  %s3915_s18 = int_to_ptr.vmem [resolvable:$true] %s398_s18 }
  0x9f   : > { %p3919_p6 = pnand %p4596_p13, %p93_p10  ;;  %s4598_s30 = sand.u32 1, %s3554_s25  }
  0xa0   : > { %s3926_s6 = scalar_lea.sflag [#allocation9], %s4598_s30 }
  0xa1   : > { %p3310_p5 = pneg %p3919_p6 }
  0xa2   : > { %s3913_s28 = scalar_lea.hbm %s4595_s1, %s2622_s12  ;;  %s3313_s0 = scalar_lea.hbm %s4595_s1, 4096 }
  0xa3   : > { %s3308_s12 = scalar_lea.hbm %s3913_s28, 2048  ;;  %p3314_p1 = scmp.lt.u32.totalorder %s3913_s28, %s4595_s1 }
  0xa4   : > { %p3309_p11 = scmp.ne.s32.totalorder %s3913_s28, %s3308_s12  ;;  %p3315_p2 = scmp.lt.u32.totalorder %s3313_s0, %s3308_s12 }
  0xa5   : > { %p3317_p9 = scmp.lt.u32.totalorder %s3308_s12, %s3913_s28 }
  0xa6   : > { %p3311_p7 = pnand %p3310_p5, %p3309_p11  ;;  %p3316_p8 = por %p3315_p2, %p3314_p1 }
  0xa8   : > { %p3312_p0 = pneg %p3311_p7  ;;  %p3318_p10 = por %p3317_p9, %p3316_p8 }
  0xaa   : > { %p3319_p4 = pnand %p3318_p10, %p3312_p0 }
  0xac   : > { %3322 = shalt.err (!%p3319_p4)
}
  0xad   : > { %s3323_s30 = scalar_lea.vmem %s3915_s18, 2048  ;;  %s3564_s29 = smov [#allocation8]  }
  0xae   : > { %p3324_p3 = scmp.ne.s32.totalorder %s3915_s18, %s3323_s30  ;;  %s3328_s8 = sshll.u32 %s3564_s29, 4  ;;  %s3329_s8 = int_to_ptr.vmem [resolvable:$false] %s3328_s8 }
  0xaf   : > { %s3330_s10 = scalar_lea.vmem %s3329_s8, 4096  ;;  %p3331_p7 = scmp.lt.s32.totalorder %s3915_s18, %s3329_s8 }
  0xb0   : > { %p3326_p13 = pnand %p3324_p3, %p3310_p5  ;;  %p3332_p1 = scmp.lt.s32.totalorder %s3330_s10, %s3323_s30 }
  0xb2   : > { %p3327_p11 = pneg %p3326_p13  ;;  %p3333_p2 = por %p3332_p1, %p3331_p7 }
  0xb4   : > { %p3334_p8 = pnand %p3333_p2, %p3327_p11 }
  0xb6   : > { %3337 = shalt.err (!%p3334_p8)
}
  0xb7   : > { %s4599_s12 = sld [smem:[#allocation32_spill]]  ;;  %p213_p5 = scmp.gt.s32.totalorder %s2484_s21, 0 }
  0xb8   : > { %2873 = dma.hbm_to_vmem [thread:$0]  (!%p3919_p6), %s3913_s28, 2048, %s3915_s18, %s3926_s6, %s4590_s3, %s4590_s3, %s4589_s22  }
  0xb9   : > { %s2485_s15 = sadd.s32 4294967294, %s4659_s27  ;;  %s221_s0 = sadd.s32 1, %s3510_s14 }
  0xba   : > { %p216_p0 = scmp.gt.s32.totalorder %s2485_s15, 0  ;;  %s4665_s21 = smov (!%p213_p5, %s2484_s21), 0 }
  0xbb   : > { %p228_p9 = scmp.ne.s32.totalorder %s3510_s14, %s3506_s13  ;;  %s287_s2 = sadd.s32 1, %s3498_s11 }
  0xbc   : > { %s4667_s15 = smov (!%p216_p0, %s2485_s15), 0  ;;  %s410_s29 = sand.u32 1, %s3510_s14  }
  0xbd   : > { %s218_s30 = ssub.s32 %s4665_s21, %s4667_s15  ;;  %p4600_p4 = scmp.eq.s32.totalorder %s3554_s25, 0 }
  0xbe   : > { %p219_p10 = scmp.eq.s32.totalorder %s218_s30, 0  ;;  %s284_s8 = sor.u32 %s218_s30, %s4599_s12 }
  0xbf   : > { %p230_p3 = por %p228_p9, %p4600_p4  ;;  %s2500_s10 = sshll.u32 %s410_s29, 7 }
  0xc0   : > { %s3971_s22 = scalar_select %p219_p10, %s3510_s14, %s221_s0  }
  0xc1   : > { %p285_p6 = scmp.eq.s32.totalorder %s284_s8, 0  ;;  %s2623_s3 = sshll.u32 %s4665_s21, 7 }
  0xc2   : > { %s412_s28 = scalar_lea.vmem [#allocation13], %s2500_s10  ;;  %s4601_s1 = sld [smem:[#allocation42_spill]] }
  0xc3   : > { %s422_s18 = sshll.u32 %s412_s28, 4  ;;  %p4602_p13 = scmp.lt.s32.totalorder %s3554_s25, 8  ;;  %s3981_s18 = int_to_ptr.vmem [resolvable:$true] %s422_s18 }
  0xc4   : > { %s3974_s6 = scalar_select %p285_p6, %s3498_s11, %s287_s2  }
  0xc5   : > { %p3985_p11 = pnand %p4602_p13, %p230_p3 }
  0xc7   : > { %p3340_p1 = pneg %p3985_p11 }
  0xc8   : > { %s3979_s5 = scalar_lea.hbm %s4601_s1, %s2623_s3  ;;  %s3343_s15 = scalar_lea.hbm %s4601_s1, 4096 }
  0xc9   : > { %s3338_s21 = scalar_lea.hbm %s3979_s5, 2048  ;;  %p3344_p5 = scmp.lt.u32.totalorder %s3979_s5, %s4601_s1 }
  0xca   : > { %p3339_p7 = scmp.ne.s32.totalorder %s3979_s5, %s3338_s21  ;;  %p3345_p0 = scmp.lt.u32.totalorder %s3343_s15, %s3338_s21 }
  0xcb   : > { %p3347_p10 = scmp.lt.u32.totalorder %s3338_s21, %s3979_s5 }
  0xcc   : > { %p3341_p2 = pnand %p3340_p1, %p3339_p7  ;;  %p3346_p9 = por %p3345_p0, %p3344_p5 }
  0xce   : > { %p3342_p8 = pneg %p3341_p2  ;;  %p3348_p4 = por %p3347_p10, %p3346_p9 }
  0xd0   : > { %p3349_p3 = pnand %p3348_p4, %p3342_p8 }
  0xd2   : > { %3352 = shalt.err (!%p3349_p3)
}
  0xd3   : > { %s3353_s30 = scalar_lea.vmem %s3981_s18, 2048  ;;  %s3565_s29 = smov [#allocation13]  }
  0xd4   : > { %p3354_p6 = scmp.ne.s32.totalorder %s3981_s18, %s3353_s30  ;;  %s3358_s8 = sshll.u32 %s3565_s29, 4  ;;  %s3359_s8 = int_to_ptr.vmem [resolvable:$false] %s3358_s8 }
  0xd5   : > { %s3360_s10 = scalar_lea.vmem %s3359_s8, 4096  ;;  %p3361_p2 = scmp.lt.s32.totalorder %s3981_s18, %s3359_s8 }
  0xd6   : > { %p3356_p13 = pnand %p3354_p6, %p3340_p1  ;;  %p3362_p5 = scmp.lt.s32.totalorder %s3360_s10, %s3353_s30 }
  0xd8   : > { %p3357_p7 = pneg %p3356_p13  ;;  %p3363_p0 = por %p3362_p5, %p3361_p2 }
  0xda   : > { %p3364_p9 = pnand %p3363_p0, %p3357_p7 }
  0xdc   : > { %3367 = shalt.err (!%p3364_p9)
}
  0xdd   : > { %s4604_s3 = smov 8   ;;  %s4605_s28 = smov 128  }
  0xde   : > { %s4606_s21 = smov 256   ;;  %s4607_s7 = sld [smem:[#allocation30_spill]] }
  0xdf   : > { %2876 = dma.hbm_to_vmem [thread:$0]  (!%p3985_p11), %s3979_s5, 2048, %s3981_s18, %s3836_s9, %s4606_s21, %s4605_s28, %s4604_s3  }
  0xe4   : > { %p4608_p1 = scmp.ne.s32.totalorder %s4607_s7, 0 }
  0xe5   : > { %s4609_s19 = sld [smem:[#allocation23_spill]] (!%p4608_p1)  ;;  %s4610_s15 = sld [smem:[#allocation33_spill]] (!%p4608_p1) }
  0xe6   : > { %448 = sbr.rel (%p4608_p1) target bundleno = 1578 (0x62a), region = 56  ;;  %s450_s0 = sand.u32 (!%p4608_p1), 1, %s3707_s26  }
  0xe7   : > { %s451_s29 = scalar_lea.sflag (!%p4608_p1), [#allocation6], %s450_s0 }
  0xeb   : > { %s452_s2 = sand.u32 (!%p4608_p1), 1, %s4609_s19   ;;  %p4611_p8 = scmp.ne.s32.totalorder (!%p4608_p1), %s4610_s15, 0 }
  0xec   : > { %s2842_s30 = smul.u32 (!%p4608_p1), 152, %s452_s2 }
  0xee   : > { %s4022_s8 = scalar_lea.vmem [#allocation5], %s2842_s30 }
  0xef   : > { %3465 = dma.done.wait (%p4611_p8), %s451_s29, 2432  }
  0xf0   : > { %3467 = vsyncadd (%p4611_p8), %s451_s29, 4294964864  ;;  %s461_s5 = sand.u32 1, %s3518_s16   ;;  %s460_s18 = scalar_lea.sflag [#allocation9], %s450_s0 }
  0xf1   : > { %s2505_s9 = sshll.u32 %s461_s5, 7 }
  0xf2   : > { %s4029_s12 = scalar_lea.vmem [#allocation8], %s2505_s9 }
  0xf3   : > { %3469 = dma.done.wait (%p3905_p12), %s460_s18, 2048  }
  0xf4   : > { %3471 = vsyncadd (%p3905_p12), %s460_s18, 4294965248  ;;  %p4612_p11 = scmp.eq.s32.totalorder %s3707_s26, 0 }
  0xf6   : > { %3473 = dma.done.wait (%p4612_p11), [#allocation9], 1024   ;;  %p4613_p10 = pmov %p4612_p11 }
  0xf8   : > { %3475 = vsyncadd (%p4613_p10), [#allocation9], 4294966272  ;;  %p4614_p4 = pmov %p4613_p10 }
  0xfa   : > { %3477 = dma.done.wait (%p4614_p4), [#allocation12], 1024   ;;  %p4615_p3 = pmov %p4614_p4 }
  0xfb   : > { %s4616_s10 = sld [smem:[#allocation27_spill]]  ;;  %s478_s3 = sand.u32 1, %s3506_s13  }
  0xfc   : > { %3479 = vsyncadd (%p4615_p3), [#allocation12], 4294966272  ;;  %s2508_s28 = sshll.u32 %s478_s3, 7 }
  0xfd   : > { %s4044_s21 = scalar_lea.vmem [#allocation13], %s2508_s28 }
 0x101   : > { %p4617_p6 = scmp.ne.s32.totalorder %s4616_s10, 0 }
 0x103   : > { %3481 = dma.done.wait (%p4617_p6), %s451_s29, 2048  }
 0x104   : > { %3483 = vsyncadd (%p4617_p6), %s451_s29, 4294965248  ;;  %s4618_s4 = sld [smem:[#allocation22_spill]]  ;;  %s4619_s7 = sld [smem:[#allocation24_spill]] }
 0x105   : > { %s4620_s29 = sld [smem:[#allocation43_spill]] }
 0x10a   : > { %s529_s19 = sand.u32 1, %s4618_s4   ;;  %s2509_s15 = sadd.s32 4294967294, %s4619_s7 }
 0x10b   : > { %s2843_s0 = smul.u32 304, %s529_s19  ;;  %p544_p12 = scmp.gt.s32.totalorder %s2509_s15, 0 }
 0x10c   : > { %p2511_p7 = scmp.ne.s32.totalorder %s4619_s7, 0 }
 0x10d   : > { %s4669_s15 = smov (!%p544_p12, %s2509_s15), 0  ;;  %s4064_s18 = scalar_lea.vmem [#allocation14], %s2843_s0  ;;  %vm583_vm0 = vcmask (!%p2511_p7), 7168   ;;  %v3566_v0 = vmov (!%p2511_p7), 0.0  }
 0x10e   : > { %s4054_s26 = sshll.u32 %s4669_s15, 1  ;;  %563 = sbr.rel (%p2511_p7) target bundleno = 290 (0x122), region = 80  ;;  %564 = vst [vmem:[#allocation2] sm:$0xff] (!%p2511_p7), %v3566_v0  ;;  %565 = vst [vmem:[#allocation2 + $0x8] sm:$0xff] (!%p2511_p7), %v3566_v0 }
 0x10f   : > { %p547_p13 = scmp.lt.s32.totalorder %s4054_s26, 3  ;;  %566 = vst [vmem:[#allocation2 + $0x10] sm:$0xff] (!%p2511_p7), %v3566_v0  ;;  %567 = vst [vmem:[#allocation2 + $0x18] sm:$0xff] (!%p2511_p7), %v3566_v0 }
 0x110   : > { %568 = vst [vmem:[#allocation2 + $0x20] sm:$0xff] (!%p2511_p7), %v3566_v0  ;;  %569 = vst [vmem:[#allocation2 + $0x28] sm:$0xff] (!%p2511_p7), %v3566_v0 }
 0x111   : > { %s4058_s2 = scalar_select %p547_p13, %s4054_s26, 3 }
 0x112   : > { %570 = vst [vmem:[#allocation2 + $0x30] sm:$0xff] (!%p2511_p7), %v3566_v0  ;;  %571 = vst [vmem:[#allocation2 + $0x38] sm:$0xff] (!%p2511_p7), %v3566_v0 }
 0x113   : > { %s549_s9 = scalar_lea.vmem %s4620_s29, %s4058_s2  ;;  %572 = vst [vmem:[#allocation2 + $0x40] sm:$0xff] (!%p2511_p7), %v3566_v0  ;;  %573 = vst [vmem:[#allocation2 + $0x48] sm:$0xff] (!%p2511_p7), %v3566_v0 }
 0x114   : > { %574 = vst [vmem:[#allocation2 + $0x50] sm:$0xff] (!%p2511_p7), %v3566_v0  ;;  %575 = vst [vmem:[#allocation2 + $0x58] sm:$0xff] (!%p2511_p7), %v3566_v0 }
 0x115   : > { %576 = vst [vmem:[#allocation2 + $0x60] sm:$0xff] %v3566_v0  ;;  %577 = vst [vmem:[#allocation2 + $0x68] sm:$0xff] %v3566_v0 }
 0x116   : > { %578 = vst [vmem:[#allocation2 + $0x70] sm:$0xff] %v3566_v0  ;;  %579 = vst [vmem:[#allocation2 + $0x78] sm:$0xff] %v3566_v0 }
 0x117   : > { %580 = vst [vmem:[#allocation2 + $0x80] sm:$0xff] %v3566_v0  ;;  %581 = vst [vmem:[#allocation2 + $0x88] sm:$0xff] %v3566_v0 }
 0x118   : > { %582 = vst [vmem:[#allocation2 + $0x90] sm:$0xff] %v3566_v0  ;;  %584 = vst.msk [vmem:[#allocation3] sm:$0xff] %vm583_vm0, %v3566_v0 }
 0x119   : > { %585 = vst.msk [vmem:[#allocation3 + $0x8] sm:$0xff] %vm583_vm0, %v3566_v0  ;;  %586 = vst.msk [vmem:[#allocation3 + $0x10] sm:$0xff] %vm583_vm0, %v3566_v0 }
 0x11a   : > { %587 = vst.msk [vmem:[#allocation3 + $0x18] sm:$0xff] %vm583_vm0, %v3566_v0  ;;  %588 = vst.msk [vmem:[#allocation3 + $0x20] sm:$0xff] %vm583_vm0, %v3566_v0 }
 0x11b   : > { %589 = vst.msk [vmem:[#allocation3 + $0x28] sm:$0xff] %vm583_vm0, %v3566_v0  ;;  %590 = vst.msk [vmem:[#allocation3 + $0x30] sm:$0xff] %vm583_vm0, %v3566_v0 }
 0x11c   : > { %591 = vst.msk [vmem:[#allocation3 + $0x38] sm:$0xff] %vm583_vm0, %v3566_v0  ;;  %592 = vst.msk [vmem:[#allocation3 + $0x40] sm:$0xff] %vm583_vm0, %v3566_v0 }
 0x11d   : > { %593 = vst.msk [vmem:[#allocation3 + $0x48] sm:$0xff] %vm583_vm0, %v3566_v0  ;;  %594 = vst.msk [vmem:[#allocation3 + $0x50] sm:$0xff] %vm583_vm0, %v3566_v0 }
 0x11e   : > { %595 = vst.msk [vmem:[#allocation3 + $0x58] sm:$0xff] %vm583_vm0, %v3566_v0  ;;  %596 = vst.msk [vmem:[#allocation3 + $0x60] sm:$0xff] %vm583_vm0, %v3566_v0 }
 0x11f   : > { %597 = vst.msk [vmem:[#allocation3 + $0x68] sm:$0xff] %vm583_vm0, %v3566_v0  ;;  %598 = vst.msk [vmem:[#allocation3 + $0x70] sm:$0xff] %vm583_vm0, %v3566_v0 }
 0x120   : > { %599 = vst.msk [vmem:[#allocation3 + $0x78] sm:$0xff] %vm583_vm0, %v3566_v0  ;;  %600 = vst.msk [vmem:[#allocation3 + $0x80] sm:$0xff] %vm583_vm0, %v3566_v0 }
 0x121   : > { %601 = vst.msk [vmem:[#allocation3 + $0x88] sm:$0xff] %vm583_vm0, %v3566_v0  ;;  %602 = vst.msk [vmem:[#allocation3 + $0x90] sm:$0xff] %vm583_vm0, %v3566_v0 }
 0x122 PF: > { %s4621_s10 = sld [smem:[#allocation24_spill]] }
 0x128   : > { %p2512_p2 = scmp.ge.s32.totalorder %s4621_s10, 2 }
 0x129   : > { %v3036_v1 = vld [vmem:[%s4029_s12 + $0x40] sm:$0xff] (!%p2512_p2)   ;;  %v3038_v3 = vld [vmem:[%s4029_s12 + $0x48] sm:$0xff] (!%p2512_p2)   ;;  %v3040_v5 = vld [vmem:[%s4029_s12 + $0x50] sm:$0xff] (!%p2512_p2)   ;;  %vm797_vm1 = vcmask (!%p2512_p2), 7168  }
 0x12a   : > { %606 = sbr.rel (%p2512_p2) target bundleno = 582 (0x246), region = 84  ;;  %v3037_v2 = vld [vmem:[%s4029_s12] sm:$0xff] (!%p2512_p2)   ;;  %2625 = vmatprep.subr.bf16.mxu0 (!%p2512_p2), %v3036_v1  ;;  %2809 = vmatprep.subr.bf16.mxu1 (!%p2512_p2), %v3036_v1  ;;  %v3039_v4 = vld [vmem:[%s4029_s12 + $0x8] sm:$0xff] (!%p2512_p2)   ;;  %v3041_v6 = vld [vmem:[%s4029_s12 + $0x10] sm:$0xff] (!%p2512_p2)  }
 0x12b   : > { %2626 = vmatpush3.bf16.msra.mxu0 (!%p2512_p2), %v3037_v2  ;;  %2817 = vmatpush3.bf16.msra.mxu1 (!%p2512_p2), %v3037_v2  ;;  %v3042_v7 = vld [vmem:[%s4029_s12 + $0x58] sm:$0xff] (!%p2512_p2)   ;;  %v3044_v9 = vld [vmem:[%s4029_s12 + $0x60] sm:$0xff] (!%p2512_p2)   ;;  %v3046_v11 = vld [vmem:[%s4029_s12 + $0x68] sm:$0xff] (!%p2512_p2)  }
 0x12c   : > { %2627 = vmatprep.subr.bf16.mxu0 (!%p2512_p2), %v3038_v3  ;;  %2810 = vmatprep.subr.bf16.mxu1 (!%p2512_p2), %v3038_v3  ;;  %v3043_v8 = vld [vmem:[%s4029_s12 + $0x18] sm:$0xff] (!%p2512_p2)   ;;  %v3045_v10 = vld [vmem:[%s4029_s12 + $0x20] sm:$0xff] (!%p2512_p2)   ;;  %v4099_v12 = vld [vmem:[%s4022_s8] sm:$0xff] (!%p2512_p2) }
 0x12d   : > { %v4102_v13 = vld [vmem:[%s4022_s8 + $0x8] sm:$0xff] (!%p2512_p2)  ;;  %v4105_v14 = vld [vmem:[%s4022_s8 + $0x50] sm:$0xff] (!%p2512_p2)  ;;  %v4110_v16 = vld [vmem:[%s4022_s8 + $0x58] sm:$0xff] (!%p2512_p2)  ;;  %v626_v17 = vunpack.c.l.bf16 (!%p2512_p2), %v4099_v12  ;;  %v627_v21 = vunpack.c.h.bf16 (!%p2512_p2), %v4099_v12 }
 0x12e   : > { %v2514_v15 = vcombine.high (!%p2512_p2), %v4099_v12, %v4102_v13  ;;  %v2524_v18 = vcombine.high (!%p2512_p2), %v4105_v14, %v4110_v16  ;;  %v3047_v19 = vld [vmem:[%s4029_s12 + $0x28] sm:$0xff] (!%p2512_p2)   ;;  %v4117_v20 = vld [vmem:[%s4022_s8 + $0x10] sm:$0xff] (!%p2512_p2)  ;;  %v3048_v22 = vld [vmem:[%s4029_s12 + $0x70] sm:$0xff] (!%p2512_p2)   ;;  %v628_v26 = vunpack.c.l.bf16 (!%p2512_p2), %v4102_v13  ;;  %v629_v30 = vunpack.c.h.bf16 (!%p2512_p2), %v4102_v13 }
 0x12f   : > { %2628 = vmatpush3.bf16.msra.mxu0 (!%p2512_p2), %v3039_v4  ;;  %2818 = vmatpush3.bf16.msra.mxu1 (!%p2512_p2), %v3039_v4  ;;  %v630_v23 = vunpack.c.l.bf16 (!%p2512_p2), %v4117_v20  ;;  %v631_v24 = vunpack.c.h.bf16 (!%p2512_p2), %v4117_v20  ;;  %v683_v25 = vmul.f32 (!%p2512_p2), %v626_v17, %v626_v17  ;;  %v3049_v27 = vld [vmem:[%s4029_s12 + $0x30] sm:$0xff] (!%p2512_p2)   ;;  %v4126_v28 = vld [vmem:[%s4022_s8 + $0x18] sm:$0xff] (!%p2512_p2)  ;;  %v684_v29 = vmul.f32 (!%p2512_p2), %v627_v21, %v627_v21  ;;  %v3050_v31 = vld [vmem:[%s4029_s12 + $0x78] sm:$0xff] (!%p2512_p2)  }
 0x130   : > { %2629 = vmatprep.subr.bf16.mxu0 (!%p2512_p2), %v3040_v5  ;;  %2811 = vmatprep.subr.bf16.mxu1 (!%p2512_p2), %v3040_v5  ;;  %v4131_v32 = vld [vmem:[%s4022_s8 + $0x20] sm:$0xff] (!%p2512_p2)  ;;  %v685_v35 = vmul.f32 (!%p2512_p2), %v628_v26, %v628_v26  ;;  %v632_v36 = vunpack.c.l.bf16 (!%p2512_p2), %v4126_v28  ;;  %v4135_v37 = vld [vmem:[%s4022_s8 + $0x28] sm:$0xff] (!%p2512_p2)  ;;  %v686_v39 = vmul.f32 (!%p2512_p2), %v629_v30, %v629_v30  ;;  %v633_v40 = vunpack.c.h.bf16 (!%p2512_p2), %v4126_v28  ;;  %v4143_v47 = vld [vmem:[%s4022_s8 + $0x30] sm:$0xff] (!%p2512_p2) }
 0x131   : > { %1093 = vmatprep.mubr.bf16.mxu0 %v2514_v15  ;;  %1133 = vmatprep.mubr.bf16.mxu1 %v2524_v18  ;;  %v687_v33 = vmul.f32 %v630_v23, %v630_v23  ;;  %v688_v34 = vmul.f32 %v631_v24, %v631_v24  ;;  %v721_v38 = vadd.f32 %v684_v29, %v683_v25  ;;  %v634_v41 = vunpack.c.l.bf16 %v4131_v32  ;;  %v3051_v46 = vld [vmem:[%s4029_s12 + $0x38] sm:$0xff]   ;;  %v4147_v52 = vld [vmem:[%s4022_s8 + $0x60] sm:$0xff]  ;;  %v4153_v54 = vld [vmem:[%s4022_s8 + $0x38] sm:$0xff] }
 0x132   : > { %v689_v43 = vmul.f32 %v632_v36, %v632_v36  ;;  %v635_v44 = vunpack.c.h.bf16 %v4131_v32  ;;  %v636_v45 = vunpack.c.l.bf16 %v4135_v37  ;;  %v724_v48 = vadd.f32 %v686_v39, %v685_v35  ;;  %v4150_v53 = vld [vmem:[%s4022_s8 + $0x68] sm:$0xff]  ;;  %v4168_v3 = vld [vmem:[%s4022_s8 + $0x40] sm:$0xff]  ;;  %v621_v21 = vld [vmem:[%s4022_s8 + $0x70] sm:$0xff] }
 0x133   : > { %2630 = vmatpush3.bf16.msra.mxu0 %v3041_v6  ;;  %2819 = vmatpush3.bf16.msra.mxu1 %v3041_v6  ;;  %v727_v42 = vadd.f32 %v688_v34, %v687_v33  ;;  %v690_v49 = vmul.f32 %v633_v40, %v633_v40  ;;  %v691_v50 = vmul.f32 %v634_v41, %v634_v41  ;;  %v637_v51 = vunpack.c.h.bf16 %v4135_v37  ;;  %v4171_v6 = vld [vmem:[%s4022_s8 + $0x48] sm:$0xff] }
 0x134   : > { %2631 = vmatprep.subr.bf16.mxu0 %v3042_v7  ;;  %2812 = vmatprep.subr.bf16.mxu1 %v3042_v7  ;;  %v692_v55 = vmul.f32 %v635_v44, %v635_v44  ;;  %v693_v56 = vmul.f32 %v636_v45, %v636_v45  ;;  %v638_v57 = vunpack.c.l.bf16 %v4143_v47  ;;  %v639_v58 = vunpack.c.h.bf16 %v4143_v47 }
 0x135   : > { %722 = vadd.xlane.f32.xlu0 %v721_v38  ;;  %728 = vadd.xlane.f32.xlu1 %v727_v42  ;;  %v730_v59 = vadd.f32 %v690_v49, %v689_v43  ;;  %v694_v60 = vmul.f32 %v637_v51, %v637_v51  ;;  %v640_v61 = vunpack.c.l.bf16 %v4153_v54  ;;  %v641_v62 = vunpack.c.h.bf16 %v4153_v54 }
 0x136   : > { %v2513_v63 = vcombine.low %v4099_v12, %v4102_v13  ;;  %v2523_v0 = vcombine.low %v4105_v14, %v4110_v16  ;;  %v2516_v1 = vcombine.high %v4117_v20, %v4126_v28  ;;  %v2526_v2 = vcombine.high %v4147_v52, %v4150_v53 }
 0x137   : > { %2632 = vmatpush3.bf16.msra.mxu0 %v3043_v8  ;;  %2820 = vmatpush3.bf16.msra.mxu1 %v3043_v8  ;;  %v695_v4 = vmul.f32 %v638_v57, %v638_v57  ;;  %v696_v5 = vmul.f32 %v639_v58, %v639_v58  ;;  %v733_v7 = vadd.f32 %v692_v55, %v691_v50  ;;  %v644_v13 = vunpack.c.l.bf16 %v4171_v6 }
 0x138   : > { %2633 = vmatprep.subr.bf16.mxu0 %v3044_v9  ;;  %2813 = vmatprep.subr.bf16.mxu1 %v3044_v9  ;;  %v736_v8 = vadd.f32 %v694_v60, %v693_v56  ;;  %v642_v9 = vunpack.c.l.bf16 %v4168_v3  ;;  %v698_v12 = vmul.f32 %v641_v62, %v641_v62  ;;  %v645_v15 = vunpack.c.h.bf16 %v4171_v6 }
 0x139   : > { %725 = vadd.xlane.f32.xlu0 %v724_v48  ;;  %731 = vadd.xlane.f32.xlu1 %v730_v59  ;;  %v739_v17 = vadd.f32 %v696_v5, %v695_v4  ;;  %v646_v18 = vunpack.c.l.bf16 %v4105_v14  ;;  %v648_v25 = vunpack.c.l.bf16 %v4110_v16  ;;  %v649_v26 = vunpack.c.h.bf16 %v4110_v16  ;;  %v624_v48 = vld [vmem:[%s4022_s8 + $0x88] sm:$0xff] }
 0x13a   : > { %v699_v23 = vmul.f32 %v642_v9, %v642_v9  ;;  %v701_v29 = vmul.f32 %v644_v13, %v644_v13  ;;  %v702_v30 = vmul.f32 %v645_v15, %v645_v15  ;;  %v2525_v33 = vcombine.low %v4147_v52, %v4150_v53 }
 0x13b   : > { %2634 = vmatpush3.bf16.msra.mxu0 %v3045_v10  ;;  %2821 = vmatpush3.bf16.msra.mxu1 %v3045_v10  ;;  %v643_v10 = vunpack.c.h.bf16 %v4168_v3  ;;  %v703_v35 = vmul.f32 %v646_v18, %v646_v18  ;;  %v705_v39 = vmul.f32 %v648_v25, %v648_v25  ;;  %v706_v16 = vmul.f32 %v649_v26, %v649_v26 }
 0x13c   : > { %2635 = vmatprep.subr.bf16.mxu0 %v3046_v11  ;;  %2814 = vmatprep.subr.bf16.mxu1 %v3046_v11  ;;  %v697_v11 = vmul.f32 %v640_v61, %v640_v61  ;;  %v650_v40 = vunpack.c.l.bf16 %v4147_v52  ;;  %v748_v41 = vadd.f32 %v702_v30, %v701_v29  ;;  %v653_v42 = vunpack.c.h.bf16 %v4150_v53  ;;  %v664_v29 = vld [vmem:[#allocation3] sm:$0xff]  ;;  %v666_v30 = vld [vmem:[#allocation3 + $0x10] sm:$0xff] }
 0x13d   : > { %v700_v24 = vmul.f32 %v643_v10, %v643_v10  ;;  %734 = vadd.xlane.f32.xlu0 %v733_v7  ;;  %737 = vadd.xlane.f32.xlu1 %v736_v8  ;;  %v654_v44 = vunpack.c.l.bf16 %v621_v21  ;;  %v655_v45 = vunpack.c.h.bf16 %v621_v21  ;;  %v754_v49 = vadd.f32 %v706_v16, %v705_v39  ;;  %v668_v16 = vld [vmem:[#allocation3 + $0x20] sm:$0xff] }
 0x13e   : > { %v707_v50 = vmul.f32 %v650_v40, %v650_v40  ;;  %v710_v57 = vmul.f32 %v653_v42, %v653_v42  ;;  %v2520_v59 = vcombine.high %v4143_v47, %v4153_v54  ;;  %v660_v7 = vunpack.c.l.bf16 %v624_v48  ;;  %v669_v40 = vld [vmem:[#allocation3 + $0x28] sm:$0xff] }
 0x13f   : > { %2636 = vmatpush3.bf16.msra.mxu0 %v3047_v19  ;;  %2822 = vmatpush3.bf16.msra.mxu1 %v3047_v19  ;;  %v647_v19 = vunpack.c.h.bf16 %v4105_v14  ;;  %v2518_v14 = vcombine.high %v4131_v32, %v4135_v37  ;;  %v745_v38 = vadd.f32 %v700_v24, %v699_v23  ;;  %v711_v61 = vmul.f32 %v654_v44, %v654_v44  ;;  %v671_v44 = vld [vmem:[#allocation3 + $0x38] sm:$0xff] }
 0x140   : > { %2637 = vmatprep.subr.bf16.mxu0 %v3048_v22  ;;  %2815 = vmatprep.subr.bf16.mxu1 %v3048_v22  ;;  %v622_v22 = vld [vmem:[%s4022_s8 + $0x78] sm:$0xff]  ;;  %v712_v62 = vmul.f32 %v655_v45, %v655_v45  ;;  %v661_v8 = vunpack.c.h.bf16 %v624_v48  ;;  %v2519_v18 = vcombine.low %v4143_v47, %v4153_v54  ;;  %v2521_v47 = vcombine.low %v4168_v3, %v4171_v6 }
 0x141   : > { %v2528_v34 = vcombine.high %v621_v21, %v622_v22  ;;  %v704_v36 = vmul.f32 %v647_v19, %v647_v19  ;;  %740 = vadd.xlane.f32.xlu0 %v739_v17  ;;  %v656_v51 = vunpack.c.l.bf16 %v622_v22  ;;  %v657_v55 = vunpack.c.h.bf16 %v622_v22 }
 0x142   : > { %v2527_v58 = vcombine.low %v621_v21, %v622_v22  ;;  %v718_v13 = vmul.f32 %v661_v8, %v661_v8  ;;  %v2522_v21 = vcombine.high %v4168_v3, %v4171_v6  ;;  %v679_v8 = vld [vmem:[#allocation3 + $0x78] sm:$0xff] }
 0x143   : > { %2638 = vmatpush3.bf16.msra.mxu0 %v3049_v27  ;;  %2823 = vmatpush3.bf16.msra.mxu1 %v3049_v27  ;;  %v742_v27 = vadd.f32 %v698_v12, %v697_v11  ;;  %v751_v43 = vadd.f32 %v704_v36, %v703_v35  ;;  %v717_v12 = vmul.f32 %v660_v7, %v660_v7  ;;  %v665_v35 = vld [vmem:[#allocation3 + $0x8] sm:$0xff]  ;;  %v667_v36 = vld [vmem:[#allocation3 + $0x18] sm:$0xff]  ;;  %v678_v7 = vld [vmem:[#allocation3 + $0x70] sm:$0xff] }
 0x144   : > { %2639 = vmatprep.subr.bf16.mxu0 %v3050_v31  ;;  %2816 = vmatprep.subr.bf16.mxu1 %v3050_v31  ;;  %v2515_v31 = vcombine.low %v4117_v20, %v4126_v28  ;;  %v651_v20 = vunpack.c.h.bf16 %v4147_v52  ;;  %v652_v28 = vunpack.c.l.bf16 %v4150_v53  ;;  %v2517_v53 = vcombine.low %v4131_v32, %v4135_v37  ;;  %v625_v32 = vld [vmem:[%s4022_s8 + $0x90] sm:$0xff] }
 0x145   : > { %743 = vadd.xlane.f32.xlu1 %v742_v27  ;;  %746 = vadd.xlane.f32.xlu0 %v745_v38  ;;  %v763_v37 = vadd.f32 %v712_v62, %v711_v61  ;;  %v662_v15 = vunpack.c.l.bf16 %v625_v32  ;;  %v663_v17 = vunpack.c.h.bf16 %v625_v32  ;;  %v2532_v22 = vcombine.high %v625_v32, %v625_v32 }
 0x146   : > { %v708_v52 = vmul.f32 %v651_v20, %v651_v20  ;;  %v709_v56 = vmul.f32 %v652_v28, %v652_v28  ;;  %v772_v24 = vadd.f32 %v718_v13, %v717_v12  ;;  %v2531_v54 = vcombine.low %v625_v32, %v625_v32  ;;  %v681_v12 = vld [vmem:[#allocation3 + $0x88] sm:$0xff] }
 0x147   : > { %2640 = vmatpush3.bf16.msra.mxu0 %v3051_v46  ;;  %2824 = vmatpush3.bf16.msra.mxu1 %v3051_v46  ;;  %v623_v46 = vld [vmem:[%s4022_s8 + $0x80] sm:$0xff]  ;;  %v719_v25 = vmul.f32 %v662_v15, %v662_v15  ;;  %v720_v26 = vmul.f32 %v663_v17, %v663_v17 }
 0x148   : > { %v2530_v60 = vcombine.high %v623_v46, %v624_v48  ;;  %v757_v4 = vadd.f32 %v708_v52, %v707_v50  ;;  %v760_v5 = vadd.f32 %v710_v57, %v709_v56  ;;  %v2529_v19 = vcombine.low %v623_v46, %v624_v48  ;;  %v672_v50 = vld [vmem:[#allocation3 + $0x40] sm:$0xff] }
 0x149   : > { %749 = vadd.xlane.f32.xlu1 %v748_v41  ;;  %752 = vadd.xlane.f32.xlu0 %v751_v43  ;;  %v775_v27 = vadd.f32 %v720_v26, %v719_v25  ;;  %v670_v43 = vld [vmem:[#allocation3 + $0x30] sm:$0xff]  ;;  %v817_v25 = vld [vmem:[#allocation2] sm:$0xff] }
 0x14a   : > { %1094 = vmatmul.mubr.bf16.vlgmr.msra.gmra.mrb[0].mxu0 %v2513_v63  ;;  %1134 = vmatmul.mubr.bf16.vlgmr.msra.gmra.mrb[0].mxu1 %v2523_v0  ;;  %v713_v63 = vmul.f32 %v656_v51, %v656_v51  ;;  %v714_v0 = vmul.f32 %v657_v55, %v657_v55  ;;  %v673_v51 = vld [vmem:[#allocation3 + $0x48] sm:$0xff] }
 0x14b   : > { %1101 = vmatprep.mubr.bf16.mxu0 %v2516_v1  ;;  %1141 = vmatprep.mubr.bf16.mxu1 %v2526_v2  ;;  %v658_v1 = vunpack.c.l.bf16 %v623_v46  ;;  %v659_v2 = vunpack.c.h.bf16 %v623_v46 }
 0x14c   : > { %v766_v9 = vadd.f32 %v714_v0, %v713_v63  ;;  %v676_v63 = vld [vmem:[#allocation3 + $0x60] sm:$0xff]  ;;  %v677_v0 = vld [vmem:[#allocation3 + $0x68] sm:$0xff] }
 0x14d   : > { %755 = vadd.xlane.f32.xlu1 %v754_v49  ;;  %v715_v10 = vmul.f32 %v658_v1, %v658_v1  ;;  %v716_v11 = vmul.f32 %v659_v2, %v659_v2  ;;  %758 = vadd.xlane.f32.xlu0 %v757_v4 }
 0x14f   : > { %v769_v23 = vadd.f32 %v716_v11, %v715_v10  ;;  %v680_v11 = vld [vmem:[#allocation3 + $0x80] sm:$0xff] }
 0x151   : > { %761 = vadd.xlane.f32.xlu1 %v760_v5  ;;  %764 = vadd.xlane.f32.xlu0 %v763_v37 }
 0x152   : > { %1102 = vmatmul.mubr.bf16.gmra.mrb[4].mxu0 %v2515_v31  ;;  %1142 = vmatmul.mubr.bf16.gmra.mrb[4].mxu1 %v2525_v33 }
 0x153   : > { %1109 = vmatprep.mubr.bf16.mxu0 %v2518_v14  ;;  %1149 = vmatprep.mubr.bf16.mxu1 %v2528_v34 }
 0x155   : > { %767 = vadd.xlane.f32.xlu1 %v766_v9  ;;  %770 = vadd.xlane.f32.xlu0 %v769_v23 }
 0x159   : > { %773 = vadd.xlane.f32.xlu1 %v772_v24  ;;  %776 = vadd.xlane.f32.xlu0 %v775_v27  ;;  %v827_v27 = vld [vmem:[#allocation2 + $0x50] sm:$0xff] }
 0x15a   : > { %1110 = vmatmul.mubr.bf16.gmra.mrb[8].mxu0 %v2517_v53  ;;  %1150 = vmatmul.mubr.bf16.gmra.mrb[8].mxu1 %v2527_v58  ;;  %v674_v53 = vld [vmem:[#allocation3 + $0x50] sm:$0xff]  ;;  %v675_v58 = vld [vmem:[#allocation3 + $0x58] sm:$0xff] }
 0x15b   : > { %1117 = vmatprep.mubr.bf16.mxu0 %v2520_v59  ;;  %1157 = vmatprep.mubr.bf16.mxu1 %v2530_v60 }
 0x162   : > { %1118 = vmatmul.mubr.bf16.gmra.mrb[12].mxu0 %v2519_v18  ;;  %1158 = vmatmul.mubr.bf16.gmra.mrb[12].mxu1 %v2529_v19  ;;  %v682_v19 = vld [vmem:[#allocation3 + $0x90] sm:$0xff] }
 0x163   : > { %1125 = vmatprep.mubr.bf16.mxu0 %v2522_v21  ;;  %1165 = vmatprep.mubr.bf16.mxu1 %v2532_v22 }
 0x16a   : > { %1126 = vmatmul.mubr.bf16.gmra.mrb[16].mxu0 %v2521_v47  ;;  %1166 = vmatmul.mubr.bf16.gmra.mrb[16].mxu1 %v2531_v54 }
 0x1c2   : > { %v723_v31 = vpop.xlane.xlu0 %722  ;;  %v729_v33 = vpop.xlane.xlu1 %728 }
 0x1c3   : > { %v778_v14 = vadd.f32 %v723_v31, %v664_v29  ;;  %v780_v34 = vadd.f32 %v729_v33, %v666_v30  ;;  %v818_v33 = vld [vmem:[#allocation2 + $0x8] sm:$0xff] }
 0x1c5   : > { %798 = vst.msk [vmem:[#allocation3] sm:$0xff] %vm797_vm1, %v778_v14  ;;  %800 = vst.msk [vmem:[#allocation3 + $0x10] sm:$0xff] %vm797_vm1, %v780_v34  ;;  %v828_v34 = vld [vmem:[#allocation2 + $0x58] sm:$0xff] }
 0x1c6   : > { %v726_v38 = vpop.xlane.xlu0 %725  ;;  %v732_v39 = vpop.xlane.xlu1 %731 }
 0x1c7   : > { %v779_v3 = vadd.f32 %v726_v38, %v665_v35  ;;  %v781_v6 = vadd.f32 %v732_v39, %v667_v36 }
 0x1c9   : > { %799 = vst.msk [vmem:[#allocation3 + $0x8] sm:$0xff] %vm797_vm1, %v779_v3  ;;  %801 = vst.msk [vmem:[#allocation3 + $0x18] sm:$0xff] %vm797_vm1, %v781_v6 }
 0x1ca   : > { %v735_v41 = vpop.xlane.xlu0 %734  ;;  %v738_v20 = vpop.xlane.xlu1 %737 }
 0x1cb   : > { %v782_v28 = vadd.f32 %v735_v41, %v668_v16  ;;  %v783_v42 = vadd.f32 %v738_v20, %v669_v40  ;;  %v829_v20 = vld [vmem:[#allocation2 + $0x60] sm:$0xff] }
 0x1cd   : > { %802 = vst.msk [vmem:[#allocation3 + $0x20] sm:$0xff] %vm797_vm1, %v782_v28  ;;  %803 = vst.msk [vmem:[#allocation3 + $0x28] sm:$0xff] %vm797_vm1, %v783_v42  ;;  %v819_v42 = vld [vmem:[#allocation2 + $0x10] sm:$0xff] }
 0x1ce   : > { %v741_v45 = vpop.xlane.xlu0 %740 }
 0x1cf   : > { %v784_v48 = vadd.f32 %v741_v45, %v670_v43 }
 0x1d1   : > { %804 = vst.msk [vmem:[#allocation3 + $0x30] sm:$0xff] %vm797_vm1, %v784_v48 }
 0x1d2   : > { %v744_v46 = vpop.xlane.xlu1 %743  ;;  %v747_v55 = vpop.xlane.xlu0 %746 }
 0x1d3   : > { %v785_v49 = vadd.f32 %v744_v46, %v671_v44  ;;  %v786_v56 = vadd.f32 %v747_v55, %v672_v50 }
 0x1d5   : > { %805 = vst.msk [vmem:[#allocation3 + $0x38] sm:$0xff] %vm797_vm1, %v785_v49  ;;  %806 = vst.msk [vmem:[#allocation3 + $0x40] sm:$0xff] %vm797_vm1, %v786_v56  ;;  %v820_v49 = vld [vmem:[#allocation2 + $0x18] sm:$0xff] }
 0x1d6   : > { %v750_v52 = vpop.xlane.xlu1 %749  ;;  %v753_v59 = vpop.xlane.xlu0 %752 }
 0x1d7   : > { %v787_v57 = vadd.f32 %v750_v52, %v673_v51  ;;  %v788_v61 = vadd.f32 %v753_v59, %v674_v53  ;;  %v830_v51 = vld [vmem:[#allocation2 + $0x68] sm:$0xff] }
 0x1d9   : > { %807 = vst.msk [vmem:[#allocation3 + $0x48] sm:$0xff] %vm797_vm1, %v787_v57  ;;  %808 = vst.msk [vmem:[#allocation3 + $0x50] sm:$0xff] %vm797_vm1, %v788_v61 }
 0x1da   : > { %v756_v60 = vpop.xlane.xlu1 %755  ;;  %v759_v1 = vpop.xlane.xlu0 %758 }
 0x1db   : > { %v789_v62 = vadd.f32 %v756_v60, %v675_v58  ;;  %v790_v4 = vadd.f32 %v759_v1, %v676_v63 }
 0x1dd   : > { %809 = vst.msk [vmem:[#allocation3 + $0x58] sm:$0xff] %vm797_vm1, %v789_v62  ;;  %810 = vst.msk [vmem:[#allocation3 + $0x60] sm:$0xff] %vm797_vm1, %v790_v4  ;;  %v831_v62 = vld [vmem:[#allocation2 + $0x70] sm:$0xff] }
 0x1de   : > { %v762_v2 = vpop.xlane.xlu1 %761  ;;  %v765_v32 = vpop.xlane.xlu0 %764 }
 0x1df   : > { %v791_v5 = vadd.f32 %v762_v2, %v677_v0  ;;  %v792_v9 = vadd.f32 %v765_v32, %v678_v7  ;;  %v821_v0 = vld [vmem:[#allocation2 + $0x20] sm:$0xff] }
 0x1e1   : > { %811 = vst.msk [vmem:[#allocation3 + $0x68] sm:$0xff] %vm797_vm1, %v791_v5  ;;  %812 = vst.msk [vmem:[#allocation3 + $0x70] sm:$0xff] %vm797_vm1, %v792_v9 }
 0x1e2   : > { %v768_v37 = vpop.xlane.xlu1 %767  ;;  %v771_v13 = vpop.xlane.xlu0 %770 }
 0x1e3   : > { %v793_v10 = vadd.f32 %v768_v37, %v679_v8  ;;  %v794_v17 = vadd.f32 %v771_v13, %v680_v11  ;;  %v822_v8 = vld [vmem:[#allocation2 + $0x28] sm:$0xff]  ;;  %v832_v37 = vld [vmem:[#allocation2 + $0x78] sm:$0xff] }
 0x1e5   : > { %813 = vst.msk [vmem:[#allocation3 + $0x78] sm:$0xff] %vm797_vm1, %v793_v10  ;;  %814 = vst.msk [vmem:[#allocation3 + $0x80] sm:$0xff] %vm797_vm1, %v794_v17 }
 0x1e6   : > { %v774_v15 = vpop.xlane.xlu1 %773  ;;  %v777_v21 = vpop.xlane.xlu0 %776 }
 0x1e7   : > { %v795_v18 = vadd.f32 %v774_v15, %v681_v12  ;;  %v796_v22 = vadd.f32 %v777_v21, %v682_v19  ;;  %v833_v21 = vld [vmem:[#allocation2 + $0x80] sm:$0xff] }
 0x1e9   : > { %815 = vst.msk [vmem:[#allocation3 + $0x88] sm:$0xff] %vm797_vm1, %v795_v18  ;;  %816 = vst.msk [vmem:[#allocation3 + $0x90] sm:$0xff] %vm797_vm1, %v796_v22 }
 0x21d   : > { %v2641_v23 = vpop.f32.mrb[0].mxu0  ;;  %v2671_v24 = vpop.f32.mrb[0].mxu1 }
 0x21e   : > { %v2642_v26 = vpop.f32.mrb[1].mxu0  ;;  %v2672_v47 = vpop.f32.mrb[1].mxu1 }
 0x21f   : > { %v2643_v54 = vadd.f32 %v2642_v26, %v2641_v23  ;;  %v2673_v29 = vadd.f32 %v2672_v47, %v2671_v24  ;;  %v2644_v30 = vpop.f32.mrb[2].mxu0  ;;  %v2674_v31 = vpop.f32.mrb[2].mxu1  ;;  %v823_v23 = vld [vmem:[#allocation2 + $0x30] sm:$0xff] }
 0x220   : > { %v2645_v14 = vpop.f32.mrb[3].mxu0  ;;  %v2675_v35 = vpop.f32.mrb[3].mxu1 }
 0x221   : > { %v1173_v36 = vadd.f32 %v2643_v54, %v817_v25  ;;  %v1183_v38 = vadd.f32 %v2673_v29, %v827_v27  ;;  %v2646_v39 = vadd.f32 %v2645_v14, %v2644_v30  ;;  %v2676_v3 = vadd.f32 %v2675_v35, %v2674_v31  ;;  %v824_v54 = vld [vmem:[#allocation2 + $0x38] sm:$0xff]  ;;  %v834_v30 = vld [vmem:[#allocation2 + $0x88] sm:$0xff] }
 0x223   : > { %1192 = vst [vmem:[#allocation2] sm:$0xff] %v1173_v36  ;;  %1202 = vst [vmem:[#allocation2 + $0x50] sm:$0xff] %v1183_v38  ;;  %v1174_v6 = vadd.f32 %v2646_v39, %v818_v33  ;;  %v1184_v16 = vadd.f32 %v2676_v3, %v828_v34 }
 0x225   : > { %1193 = vst [vmem:[#allocation2 + $0x8] sm:$0xff] %v1174_v6  ;;  %1203 = vst [vmem:[#allocation2 + $0x58] sm:$0xff] %v1184_v16  ;;  %v2647_v40 = vpop.f32.mrb[4].mxu0  ;;  %v2677_v41 = vpop.f32.mrb[4].mxu1  ;;  %v835_v6 = vld [vmem:[#allocation2 + $0x90] sm:$0xff] }
 0x226   : > { %v2678_v28 = vpop.f32.mrb[5].mxu1  ;;  %v2648_v43 = vpop.f32.mrb[5].mxu0 }
 0x227   : > { %v2679_v44 = vadd.f32 %v2678_v28, %v2677_v41  ;;  %v2649_v45 = vadd.f32 %v2648_v43, %v2647_v40  ;;  %v2650_v46 = vpop.f32.mrb[6].mxu0  ;;  %v2680_v48 = vpop.f32.mrb[6].mxu1  ;;  %v825_v40 = vld [vmem:[#allocation2 + $0x40] sm:$0xff] }
 0x228   : > { %v2651_v50 = vpop.f32.mrb[7].mxu0  ;;  %v2681_v55 = vpop.f32.mrb[7].mxu1 }
 0x229   : > { %v1185_v52 = vadd.f32 %v2679_v44, %v829_v20  ;;  %v1175_v56 = vadd.f32 %v2649_v45, %v819_v42  ;;  %v2652_v57 = vadd.f32 %v2651_v50, %v2650_v46  ;;  %v2682_v53 = vadd.f32 %v2681_v55, %v2680_v48  ;;  %v826_v44 = vld [vmem:[#allocation2 + $0x48] sm:$0xff] }
 0x22b   : > { %1204 = vst [vmem:[#allocation2 + $0x60] sm:$0xff] %v1185_v52  ;;  %1194 = vst [vmem:[#allocation2 + $0x10] sm:$0xff] %v1175_v56  ;;  %v1176_v58 = vadd.f32 %v2652_v57, %v820_v49  ;;  %v1186_v59 = vadd.f32 %v2682_v53, %v830_v51 }
 0x22d   : > { %1195 = vst [vmem:[#allocation2 + $0x18] sm:$0xff] %v1176_v58  ;;  %1205 = vst [vmem:[#allocation2 + $0x68] sm:$0xff] %v1186_v59  ;;  %v2653_v60 = vpop.f32.mrb[8].mxu0  ;;  %v2683_v61 = vpop.f32.mrb[8].mxu1 }
 0x22e   : > { %v2684_v63 = vpop.f32.mrb[9].mxu1  ;;  %v2654_v1 = vpop.f32.mrb[9].mxu0 }
 0x22f   : > { %v2685_v2 = vadd.f32 %v2684_v63, %v2683_v61  ;;  %v2655_v4 = vadd.f32 %v2654_v1, %v2653_v60  ;;  %v2656_v5 = vpop.f32.mrb[10].mxu0  ;;  %v2686_v7 = vpop.f32.mrb[10].mxu1 }
 0x230   : > { %v2657_v32 = vpop.f32.mrb[11].mxu0  ;;  %v2687_v9 = vpop.f32.mrb[11].mxu1 }
 0x231   : > { %v1187_v10 = vadd.f32 %v2685_v2, %v831_v62  ;;  %v1177_v11 = vadd.f32 %v2655_v4, %v821_v0  ;;  %v2658_v12 = vadd.f32 %v2657_v32, %v2656_v5  ;;  %v2688_v13 = vadd.f32 %v2687_v9, %v2686_v7 }
 0x233   : > { %1206 = vst [vmem:[#allocation2 + $0x70] sm:$0xff] %v1187_v10  ;;  %1196 = vst [vmem:[#allocation2 + $0x20] sm:$0xff] %v1177_v11  ;;  %v1178_v15 = vadd.f32 %v2658_v12, %v822_v8  ;;  %v1188_v17 = vadd.f32 %v2688_v13, %v832_v37 }
 0x235   : > { %1197 = vst [vmem:[#allocation2 + $0x28] sm:$0xff] %v1178_v15  ;;  %1207 = vst [vmem:[#allocation2 + $0x78] sm:$0xff] %v1188_v17  ;;  %v2659_v18 = vpop.f32.mrb[12].mxu0  ;;  %v2689_v19 = vpop.f32.mrb[12].mxu1 }
 0x236   : > { %v2690_v22 = vpop.f32.mrb[13].mxu1  ;;  %v2660_v24 = vpop.f32.mrb[13].mxu0 }
 0x237   : > { %v2691_v25 = vadd.f32 %v2690_v22, %v2689_v19  ;;  %v2661_v26 = vadd.f32 %v2660_v24, %v2659_v18  ;;  %v2662_v27 = vpop.f32.mrb[14].mxu0  ;;  %v2692_v47 = vpop.f32.mrb[14].mxu1 }
 0x238   : > { %v2663_v29 = vpop.f32.mrb[15].mxu0  ;;  %v2693_v31 = vpop.f32.mrb[15].mxu1 }
 0x239   : > { %v1189_v33 = vadd.f32 %v2691_v25, %v833_v21  ;;  %v1179_v14 = vadd.f32 %v2661_v26, %v823_v23  ;;  %v2664_v34 = vadd.f32 %v2663_v29, %v2662_v27  ;;  %v2694_v35 = vadd.f32 %v2693_v31, %v2692_v47 }
 0x23b   : > { %1208 = vst [vmem:[#allocation2 + $0x80] sm:$0xff] %v1189_v33  ;;  %1198 = vst [vmem:[#allocation2 + $0x30] sm:$0xff] %v1179_v14  ;;  %v1180_v36 = vadd.f32 %v2664_v34, %v824_v54  ;;  %v1190_v38 = vadd.f32 %v2694_v35, %v834_v30 }
 0x23d   : > { %1199 = vst [vmem:[#allocation2 + $0x38] sm:$0xff] %v1180_v36  ;;  %1209 = vst [vmem:[#allocation2 + $0x88] sm:$0xff] %v1190_v38  ;;  %v2665_v39 = vpop.f32.mrb[16].mxu0  ;;  %v2695_v3 = vpop.f32.mrb[16].mxu1 }
 0x23e   : > { %v2696_v16 = vpop.f32.mrb[17].mxu1  ;;  %v2666_v41 = vpop.f32.mrb[17].mxu0 }
 0x23f   : > { %v2697_v20 = vadd.f32 %v2696_v16, %v2695_v3  ;;  %v2667_v28 = vadd.f32 %v2666_v41, %v2665_v39  ;;  %v2668_v42 = vpop.f32.mrb[18].mxu0  ;;  %v2698_v43 = vpop.f32.mrb[18].mxu1 }
 0x240   : > { %v2669_v45 = vpop.f32.mrb[19].mxu0  ;;  %v2699_v46 = vpop.f32.mrb[19].mxu1 }
 0x241   : > { %v1191_v48 = vadd.f32 %v2697_v20, %v835_v6  ;;  %v1181_v49 = vadd.f32 %v2667_v28, %v825_v40  ;;  %v2670_v50 = vadd.f32 %v2669_v45, %v2668_v42 }
 0x243   : > { %1210 = vst [vmem:[#allocation2 + $0x90] sm:$0xff] %v1191_v48  ;;  %1200 = vst [vmem:[#allocation2 + $0x40] sm:$0xff] %v1181_v49  ;;  %v1182_v51 = vadd.f32 %v2670_v50, %v826_v44 }
 0x245   : > { %1201 = vst [vmem:[#allocation2 + $0x48] sm:$0xff] %v1182_v51 }
 0x246 PF: > { %s4622_s8 = sld [smem:[#allocation24_spill]] }
 0x24c   : > { %p2549_p5 = scmp.ne.s32.totalorder %s4622_s8, 1 }
 0x24d   : > { %v1217_v55 = vld [vmem:[#allocation3 + $0x10] sm:$0xff] (!%p2549_p5)  ;;  %v1215_v52 = vld [vmem:[#allocation3] sm:$0xff] (!%p2549_p5)  ;;  %v1218_v56 = vld [vmem:[#allocation3 + $0x18] sm:$0xff] (!%p2549_p5)  ;;  %v3567_v57 = vmov (!%p2549_p5), 0   ;;  %s4623_s28 = sld [smem:[#allocation37_spill]] (!%p2549_p5)  ;;  %s4624_s15 = sld [smem:[#allocation39_spill]] (!%p2549_p5) }
 0x24e   : > { %1214 = sbr.rel (%p2549_p5) target bundleno = 1253 (0x4e5), region = 88  ;;  %3073 = vset.pattern.permute.xlu1 (!%p2549_p5), %v3567_v57  ;;  %3072 = vset.pattern.permute.xlu0 (!%p2549_p5), %v3567_v57  ;;  %v1236_v53 = vmax.f32 (!%p2549_p5), %v1217_v55, 1e-24  ;;  %v1234_v58 = vmax.f32 (!%p2549_p5), %v1215_v52, 1e-24  ;;  %v1216_v60 = vld [vmem:[#allocation3 + $0x8] sm:$0xff] (!%p2549_p5) }
 0x24f   : > { %v1237_v59 = vmax.f32 (!%p2549_p5), %v1218_v56, 1e-24  ;;  %v1220_v61 = vld [vmem:[#allocation3 + $0x28] sm:$0xff] (!%p2549_p5)  ;;  %v1235_v62 = vmax.f32 (!%p2549_p5), %v1216_v60, 1e-24  ;;  %v1219_v63 = vld [vmem:[#allocation3 + $0x20] sm:$0xff] (!%p2549_p5) }
 0x250   : > { %3090 = vrsqrt.f32 (!%p2549_p5), %v1236_v53  ;;  %v1239_v0 = vmax.f32 (!%p2549_p5), %v1220_v61, 1e-24  ;;  %v1238_v1 = vmax.f32 (!%p2549_p5), %v1219_v63, 1e-24  ;;  %v1222_v2 = vld [vmem:[#allocation3 + $0x38] sm:$0xff] (!%p2549_p5)  ;;  %v1221_v4 = vld [vmem:[#allocation3 + $0x30] sm:$0xff] (!%p2549_p5) }
 0x251   : > { %3092 = vrsqrt.f32 (!%p2549_p5), %v1234_v58  ;;  %v1224_v5 = vld [vmem:[#allocation3 + $0x48] sm:$0xff] (!%p2549_p5)  ;;  %v1241_v7 = vmax.f32 (!%p2549_p5), %v1222_v2, 1e-24  ;;  %v1240_v8 = vmax.f32 (!%p2549_p5), %v1221_v4, 1e-24  ;;  %v1223_v32 = vld [vmem:[#allocation3 + $0x40] sm:$0xff] (!%p2549_p5) }
 0x252   : > { %3094 = vrsqrt.f32 (!%p2549_p5), %v1237_v59  ;;  %v1243_v37 = vmax.f32 (!%p2549_p5), %v1224_v5, 1e-24  ;;  %v1226_v9 = vld [vmem:[#allocation3 + $0x58] sm:$0xff] (!%p2549_p5)  ;;  %v1225_v10 = vld [vmem:[#allocation3 + $0x50] sm:$0xff] (!%p2549_p5)  ;;  %v1228_v11 = vld [vmem:[#allocation3 + $0x68] sm:$0xff] (!%p2549_p5)  ;;  %s4625_s5 = sld [smem:[#allocation41_spill]] (!%p2549_p5) }
 0x253   : > { %3096 = vrsqrt.f32 (!%p2549_p5), %v1235_v62  ;;  %v1242_v13 = vmax.f32 (!%p2549_p5), %v1223_v32, 1e-24  ;;  %v3074_v15 = vld [vmem:[#allocation10] sm:$0xff] (!%p2549_p5)   ;;  %v3075_v17 = vld [vmem:[#allocation10 + $0x8] sm:$0xff] (!%p2549_p5)   ;;  %v1245_v21 = vmax.f32 (!%p2549_p5), %v1226_v9, 1e-24 }
 0x254   : > { %3098 = vrsqrt.f32 (!%p2549_p5), %v1239_v0  ;;  %v1227_v22 = vld [vmem:[#allocation3 + $0x60] sm:$0xff] (!%p2549_p5)  ;;  %2737 = vmatprep.subr.bf16.mxu0 (!%p2549_p5), %v3074_v15  ;;  %v1244_v24 = vmax.f32 (!%p2549_p5), %v1225_v10, 1e-24  ;;  %v1247_v25 = vmax.f32 (!%p2549_p5), %v1228_v11, 1e-24  ;;  %v1230_v26 = vld [vmem:[#allocation3 + $0x78] sm:$0xff] (!%p2549_p5) }
 0x255   : > { %3100 = vrsqrt.f32 %v1238_v1  ;;  %2738 = vmatpush3.bf16.msra.mxu0 %v3074_v15  ;;  %v3076_v27 = vld [vmem:[#allocation10 + $0x10] sm:$0xff]   ;;  %v1246_v47 = vmax.f32 %v1227_v22, 1e-24  ;;  %v3077_v30 = vld [vmem:[#allocation10 + $0x18] sm:$0xff]   ;;  %v1249_v31 = vmax.f32 %v1230_v26, 1e-24 }
 0x256   : > { %3102 = vrsqrt.f32 %v1241_v7  ;;  %2739 = vmatprep.subr.bf16.mxu0 %v3075_v17  ;;  %v1229_v33 = vld [vmem:[#allocation3 + $0x70] sm:$0xff]  ;;  %v1232_v38 = vld [vmem:[#allocation3 + $0x88] sm:$0xff]  ;;  %v1231_v39 = vld [vmem:[#allocation3 + $0x80] sm:$0xff] }
 0x257   : > { %3104 = vrsqrt.f32 %v1240_v8  ;;  %v3078_v35 = vld [vmem:[#allocation10 + $0x20] sm:$0xff]   ;;  %v1248_v36 = vmax.f32 %v1229_v33, 1e-24  ;;  %v1251_v16 = vmax.f32 %v1232_v38, 1e-24  ;;  %v3079_v40 = vld [vmem:[#allocation10 + $0x28] sm:$0xff]  }
 0x258   : > { %3106 = vrsqrt.f32 %v1243_v37  ;;  %v1250_v41 = vmax.f32 %v1231_v39, 1e-24  ;;  %v1233_v28 = vld [vmem:[#allocation3 + $0x90] sm:$0xff]  ;;  %v3080_v43 = vld [vmem:[#allocation10 + $0x30] sm:$0xff]   ;;  %v3083_v57 = vld [vmem:[#allocation11 + $0x8] sm:$0xff]  }
 0x259   : > { %3108 = vrsqrt.f32 %v1242_v13  ;;  %2740 = vmatpush3.bf16.msra.mxu0 %v3075_v17  ;;  %v1252_v44 = vmax.f32 %v1233_v28, 1e-24  ;;  %v3081_v48 = vld [vmem:[#allocation10 + $0x38] sm:$0xff]   ;;  %v3082_v56 = vld [vmem:[#allocation11] sm:$0xff]   ;;  %v3084_v53 = vld [vmem:[#allocation11 + $0x10] sm:$0xff]  }
 0x25a   : > { %v3091_v12 = vpop.eup %3090  ;;  %3110 = vrsqrt.f32 %v1245_v21  ;;  %2741 = vmatprep.subr.bf16.mxu0 %v3076_v27  ;;  %2773 = vmatprep.subr.bf16.mxu1 %v3082_v56  ;;  %v1274_v58 = vld [vmem:[#allocation2 + $0x10] sm:$0xff]  ;;  %v1272_v60 = vld [vmem:[#allocation2] sm:$0xff]  ;;  %v1275_v62 = vld [vmem:[#allocation2 + $0x18] sm:$0xff] }
 0x25b   : > { %v3093_v18 = vpop.eup %3092  ;;  %1303 = vperm.xlu1 %3073, %v3091_v12   ;;  %3112 = vrsqrt.f32 %v1244_v24  ;;  %2774 = vmatpush3.bf16.msra.mxu1 %v3082_v56  ;;  %v1273_v0 = vld [vmem:[#allocation2 + $0x8] sm:$0xff]  ;;  %v4229_v1 = vld [vmem:[%s4623_s28] ss:$0 sm:$0xff]  ;;  %v1279_v21 = vld [vmem:[#allocation2 + $0x38] sm:$0xff] }
 0x25c   : > { %v3095_v19 = vpop.eup %3094  ;;  %1293 = vperm.xlu0 %3072, %v3093_v18   ;;  %3114 = vrsqrt.f32 %v1247_v25  ;;  %2775 = vmatprep.subr.bf16.mxu1 %v3083_v57  ;;  %v1277_v32 = vld [vmem:[#allocation2 + $0x28] sm:$0xff]  ;;  %v1276_v10 = vld [vmem:[#allocation2 + $0x20] sm:$0xff]  ;;  %v1278_v24 = vld [vmem:[#allocation2 + $0x30] sm:$0xff] }
 0x25d   : > { %v3097_v23 = vpop.eup %3096  ;;  %2742 = vmatpush3.bf16.msra.mxu0 %v3076_v27  ;;  %3116 = vrsqrt.f32 %v1246_v47  ;;  %v1280_v33 = vld [vmem:[#allocation2 + $0x40] sm:$0xff] }
 0x25e   : > { %v3099_v54 = vpop.eup %3098  ;;  %2743 = vmatprep.subr.bf16.mxu0 %v3077_v30  ;;  %3118 = vrsqrt.f32 %v1249_v31 }
 0x25f   : > { %1308 = vperm.xlu1 %3073, %v3095_v19   ;;  %v3101_v29 = vpop.eup %3100  ;;  %3120 = vrsqrt.f32 %v1248_v36  ;;  %2776 = vmatpush3.bf16.msra.mxu1 %v3083_v57 }
 0x260   : > { %1298 = vperm.xlu0 %3072, %v3097_v23   ;;  %v3103_v14 = vpop.eup %3102  ;;  %3122 = vrsqrt.f32 %v1251_v16  ;;  %2777 = vmatprep.subr.bf16.mxu1 %v3084_v53  ;;  %v1282_v16 = vld [vmem:[#allocation2 + $0x50] sm:$0xff] }
 0x261   : > { %v3105_v34 = vpop.eup %3104  ;;  %2744 = vmatpush3.bf16.msra.mxu0 %v3077_v30  ;;  %3124 = vrsqrt.f32 %v1250_v41  ;;  %v1281_v30 = vld [vmem:[#allocation2 + $0x48] sm:$0xff] }
 0x262   : > { %v3107_v3 = vpop.eup %3106  ;;  %2745 = vmatprep.subr.bf16.mxu0 %v3078_v35  ;;  %3126 = vrsqrt.f32 %v1252_v44 }
 0x263   : > { %1318 = vperm.xlu1 %3073, %v3099_v54   ;;  %v3109_v6 = vpop.eup %3108  ;;  %2778 = vmatpush3.bf16.msra.mxu1 %v3084_v53  ;;  %v1287_v53 = vld [vmem:[#allocation2 + $0x78] sm:$0xff] }
 0x264   : > { %1313 = vperm.xlu0 %3072, %v3101_v29   ;;  %v3111_v20 = vpop.eup %3110 }
 0x265   : > { %v3113_v42 = vpop.eup %3112  ;;  %2746 = vmatpush3.bf16.msra.mxu0 %v3078_v35 }
 0x266   : > { %2747 = vmatprep.subr.bf16.mxu0 %v3079_v40  ;;  %v3115_v45 = vpop.eup %3114 }
 0x267   : > { %1328 = vperm.xlu1 %3073, %v3103_v14   ;;  %v3117_v46 = vpop.eup %3116 }
 0x268   : > { %1323 = vperm.xlu0 %3072, %v3105_v34   ;;  %v3119_v49 = vpop.eup %3118 }
 0x269   : > { %2748 = vmatpush3.bf16.msra.mxu0 %v3079_v40  ;;  %v3121_v50 = vpop.eup %3120 }
 0x26a   : > { %2749 = vmatprep.subr.bf16.mxu0 %v3080_v43  ;;  %v3123_v51 = vpop.eup %3122 }
 0x26b   : > { %1338 = vperm.xlu1 %3073, %v3107_v3   ;;  %v3125_v55 = vpop.eup %3124  ;;  %v1283_v3 = vld [vmem:[#allocation2 + $0x58] sm:$0xff] }
 0x26c   : > { %1333 = vperm.xlu0 %3072, %v3109_v6   ;;  %v3127_v52 = vpop.eup %3126 }
 0x26d   : > { %2750 = vmatpush3.bf16.msra.mxu0 %v3080_v43 }
 0x26e   : > { %2751 = vmatprep.subr.bf16.mxu0 %v3081_v48 }
 0x26f   : > { %1348 = vperm.xlu1 %3073, %v3111_v20  }
 0x270   : > { %1343 = vperm.xlu0 %3072, %v3113_v42  }
 0x271   : > { %2752 = vmatpush3.bf16.msra.mxu0 %v3081_v48 }
 0x273   : > { %1358 = vperm.xlu1 %3073, %v3115_v45   ;;  %v1285_v45 = vld [vmem:[#allocation2 + $0x68] sm:$0xff] }
 0x274   : > { %1353 = vperm.xlu0 %3072, %v3117_v46  }
 0x277   : > { %1368 = vperm.xlu1 %3073, %v3119_v49   ;;  %v1284_v49 = vld [vmem:[#allocation2 + $0x60] sm:$0xff] }
 0x278   : > { %1363 = vperm.xlu0 %3072, %v3121_v50  }
 0x27b   : > { %1378 = vperm.xlu1 %3073, %v3123_v51  }
 0x27c   : > { %1373 = vperm.xlu0 %3072, %v3125_v55  }
 0x280   : > { %1383 = vperm.xlu0 %3072, %v3127_v52  }
 0x2da   : > { %v1304_v59 = vpop.permute.xlu1 %1303 }
 0x2db   : > { %v1294_v61 = vpop.permute.xlu0 %1293  ;;  %v1388_v63 = vmul.f32 %v1304_v59, %v1274_v58 }
 0x2dc   : > { %v1386_v2 = vmul.f32 %v1294_v61, %v1272_v60  ;;  %v1286_v60 = vld [vmem:[#allocation2 + $0x70] sm:$0xff] }
 0x2dd   : > { %v1414_v37 = vadd.f32 %v4229_v1, %v1388_v63 }
 0x2de   : > { %v1309_v4 = vpop.permute.xlu1 %1308  ;;  %v1412_v11 = vadd.f32 %v4229_v1, %v1386_v2 }
 0x2df   : > { %v1389_v5 = vmul.f32 %v1309_v4, %v1275_v62  ;;  %v1299_v7 = vpop.permute.xlu0 %1298 }
 0x2e0   : > { %v1387_v8 = vmul.f32 %v1299_v7, %v1273_v0 }
 0x2e1   : > { %v1415_v9 = vadd.f32 %v4229_v1, %v1389_v5  ;;  %v1289_v5 = vld [vmem:[#allocation2 + $0x88] sm:$0xff] }
 0x2e2   : > { %v1413_v12 = vadd.f32 %v4229_v1, %v1387_v8  ;;  %v1319_v13 = vpop.permute.xlu1 %1318 }
 0x2e3   : > { %v1432_v15 = vpack.c.bf16 %v1415_v9, %v1414_v37  ;;  %v1391_v17 = vmul.f32 %v1319_v13, %v1277_v32  ;;  %v1314_v18 = vpop.permute.xlu0 %1313  ;;  %v1288_v32 = vld [vmem:[#allocation2 + $0x80] sm:$0xff] }
 0x2e4   : > { %v1390_v19 = vmul.f32 %v1314_v18, %v1276_v10  ;;  %v1431_v22 = vpack.c.bf16 %v1413_v12, %v1412_v11  ;;  %v1290_v18 = vld [vmem:[#allocation2 + $0x90] sm:$0xff] }
 0x2e5   : > { %3128 = vtanh.bf16 %v1432_v15  ;;  %v1417_v23 = vadd.f32 %v4229_v1, %v1391_v17 }
 0x2e6   : > { %v1416_v25 = vadd.f32 %v4229_v1, %v1390_v19  ;;  %v1329_v26 = vpop.permute.xlu1 %1328  ;;  %3130 = vtanh.bf16 %v1431_v22 }
 0x2e7   : > { %v1393_v27 = vmul.f32 %v1329_v26, %v1279_v21  ;;  %v1324_v47 = vpop.permute.xlu0 %1323 }
 0x2e8   : > { %v1433_v54 = vpack.c.bf16 %v1417_v23, %v1416_v25  ;;  %v1392_v29 = vmul.f32 %v1324_v47, %v1278_v24 }
 0x2e9   : > { %v1419_v31 = vadd.f32 %v4229_v1, %v1393_v27 }
 0x2ea   : > { %3132 = vtanh.bf16 %v1433_v54  ;;  %v1418_v14 = vadd.f32 %v4229_v1, %v1392_v29  ;;  %v1339_v34 = vpop.permute.xlu1 %1338 }
 0x2eb   : > { %v1395_v35 = vmul.f32 %v1339_v34, %v1281_v30  ;;  %v1334_v36 = vpop.permute.xlu0 %1333  ;;  %v3085_v30 = vld [vmem:[#allocation11 + $0x18] sm:$0xff]  }
 0x2ec   : > { %v1434_v38 = vpack.c.bf16 %v1419_v31, %v1418_v14  ;;  %v1394_v39 = vmul.f32 %v1334_v36, %v1280_v33  ;;  %2779 = vmatprep.subr.bf16.mxu1 %v3085_v30  ;;  %v3086_v31 = vld [vmem:[#allocation11 + $0x20] sm:$0xff]   ;;  %v3087_v33 = vld [vmem:[#allocation11 + $0x28] sm:$0xff]   ;;  %v3089_v14 = vld [vmem:[#allocation11 + $0x38] sm:$0xff]  }
 0x2ed   : > { %v1421_v6 = vadd.f32 %v4229_v1, %v1395_v35  ;;  %2780 = vmatpush3.bf16.msra.mxu1 %v3085_v30  ;;  %v4253_v35 = vld [vmem:[%s4624_s15] ss:$0 sm:$0xff] }
 0x2ee   : > { %3134 = vtanh.bf16 %v1434_v38  ;;  %v1420_v40 = vadd.f32 %v4229_v1, %v1394_v39  ;;  %v1349_v41 = vpop.permute.xlu1 %1348  ;;  %2781 = vmatprep.subr.bf16.mxu1 %v3086_v31 }
 0x2ef   : > { %v1397_v20 = vmul.f32 %v1349_v41, %v1283_v3  ;;  %v1344_v28 = vpop.permute.xlu0 %1343 }
 0x2f0   : > { %v3129_v42 = vpop.eup %3128  ;;  %v1435_v43 = vpack.c.bf16 %v1421_v6, %v1420_v40  ;;  %v1396_v44 = vmul.f32 %v1344_v28, %v1282_v16 }
 0x2f1   : > { %v3131_v46 = vpop.eup %3130  ;;  %v1423_v48 = vadd.f32 %v4229_v1, %v1397_v20  ;;  %2782 = vmatpush3.bf16.msra.mxu1 %v3086_v31 }
 0x2f2   : > { %3136 = vtanh.bf16 %v1435_v43  ;;  %v1422_v50 = vadd.f32 %v4229_v1, %v1396_v44  ;;  %2753 = vmatprep.mubr.bf16.mxu0 %v3131_v46  ;;  %v1359_v51 = vpop.permute.xlu1 %1358  ;;  %2783 = vmatprep.subr.bf16.mxu1 %v3087_v33 }
 0x2f3   : > { %v1399_v55 = vmul.f32 %v1359_v51, %v1285_v45  ;;  %2754 = vmatmul.mubr.bf16.vlgmr.msra.gmra.mrb[0].mxu0 %v3129_v42  ;;  %v1354_v52 = vpop.permute.xlu0 %1353 }
 0x2f4   : > { %v1436_v56 = vpack.c.bf16 %v1423_v48, %v1422_v50  ;;  %v1398_v57 = vmul.f32 %v1354_v52, %v1284_v49 }
 0x2f5   : > { %v3133_v58 = vpop.eup %3132  ;;  %v1425_v59 = vadd.f32 %v4229_v1, %v1399_v55  ;;  %2784 = vmatpush3.bf16.msra.mxu1 %v3087_v33  ;;  %v4277_v33 = vld [vmem:[%s4625_s5] ss:$0 sm:$0xff] }
 0x2f6   : > { %3138 = vtanh.bf16 %v1436_v56  ;;  %v1424_v61 = vadd.f32 %v4229_v1, %v1398_v57  ;;  %2757 = vmatprep.mubr.bf16.mxu0 %v3133_v58  ;;  %v1369_v62 = vpop.permute.xlu1 %1368 }
 0x2f7   : > { %v1401_v63 = vmul.f32 %v1369_v62, %v1287_v53  ;;  %v1364_v0 = vpop.permute.xlu0 %1363 }
 0x2f8   : > { %v1437_v2 = vpack.c.bf16 %v1425_v59, %v1424_v61  ;;  %v1400_v4 = vmul.f32 %v1364_v0, %v1286_v60 }
 0x2f9   : > { %v3135_v7 = vpop.eup %3134  ;;  %v1427_v8 = vadd.f32 %v4229_v1, %v1401_v63 }
 0x2fa   : > { %3140 = vtanh.bf16 %v1437_v2  ;;  %v1426_v37 = vadd.f32 %v4229_v1, %v1400_v4  ;;  %v1379_v9 = vpop.permute.xlu1 %1378 }
 0x2fb   : > { %v1403_v10 = vmul.f32 %v1379_v9, %v1289_v5  ;;  %2758 = vmatmul.mubr.bf16.gmra.mrb[4].mxu0 %v3135_v7  ;;  %v1374_v11 = vpop.permute.xlu0 %1373 }
 0x2fc   : > { %v1438_v12 = vpack.c.bf16 %v1427_v8, %v1426_v37  ;;  %v1402_v13 = vmul.f32 %v1374_v11, %v1288_v32 }
 0x2fd   : > { %v3137_v15 = vpop.eup %3136  ;;  %v1429_v17 = vadd.f32 %v4229_v1, %v1403_v10 }
 0x2fe   : > { %3142 = vtanh.bf16 %v1438_v12  ;;  %v1428_v19 = vadd.f32 %v4229_v1, %v1402_v13  ;;  %2761 = vmatprep.mubr.bf16.mxu0 %v3137_v15 }
 0x2ff   : > { %v1384_v21 = vpop.permute.xlu0 %1383 }
 0x300   : > { %v1439_v22 = vpack.c.bf16 %v1429_v17, %v1428_v19  ;;  %v1404_v23 = vmul.f32 %v1384_v21, %v1290_v18 }
 0x301   : > { %v3139_v24 = vpop.eup %3138 }
 0x302   : > { %3144 = vtanh.bf16 %v1439_v22  ;;  %v1430_v25 = vadd.f32 %v4229_v1, %v1404_v23  ;;  %v3088_v1 = vld [vmem:[#allocation11 + $0x30] sm:$0xff]  }
 0x303   : > { %2762 = vmatmul.mubr.bf16.gmra.mrb[8].mxu0 %v3139_v24  ;;  %2785 = vmatprep.subr.bf16.mxu1 %v3088_v1 }
 0x304   : > { %v1440_v26 = vpack.c.bf16 %v1430_v25, %v1430_v25  ;;  %2786 = vmatpush3.bf16.msra.mxu1 %v3088_v1 }
 0x305   : > { %v3141_v27 = vpop.eup %3140  ;;  %2787 = vmatprep.subr.bf16.mxu1 %v3089_v14 }
 0x306   : > { %3146 = vtanh.bf16 %v1440_v26  ;;  %2765 = vmatprep.mubr.bf16.mxu0 %v3141_v27 }
 0x308   : > { %2788 = vmatpush3.bf16.msra.mxu1 %v3089_v14 }
 0x309   : > { %v3143_v47 = vpop.eup %3142 }
 0x30b   : > { %2766 = vmatmul.mubr.bf16.gmra.mrb[12].mxu0 %v3143_v47 }
 0x30d   : > { %v3145_v54 = vpop.eup %3144 }
 0x30e   : > { %2769 = vmatprep.mubr.bf16.mxu0 %v3145_v54 }
 0x311   : > { %v3147_v29 = vpop.eup %3146 }
 0x313   : > { %2770 = vmatmul.mubr.bf16.gmra.mrb[16].mxu0 %v3147_v29 }
 0x3c6   : > { %v2755_v34 = vpop.f32.mrb[0].mxu0 }
 0x3c7   : > { %v1556_v36 = vpop.f32.mrb[1].mxu0  ;;  %v1565_v39 = vadd.f32 %v2755_v34, %v4253_v35 }
 0x3c8   : > { %v2756_v38 = vpop.f32.mrb[2].mxu0  ;;  %v1557_v16 = vadd.f32 %v4253_v35, %v1556_v36 }
 0x3c9   : > { %v1568_v3 = vadd.f32 %v2756_v38, %v4253_v35  ;;  %v1559_v6 = vpop.f32.mrb[3].mxu0 }
 0x3ca   : > { %v1560_v40 = vadd.f32 %v4253_v35, %v1559_v6 }
 0x3cb   : > { %v1635_v41 = vpack.c.bf16 %v1568_v3, %v1565_v39 }
 0x3cc   : > { %v1634_v20 = vpack.c.bf16 %v1560_v40, %v1557_v16 }
 0x3ce   : > { %v2759_v28 = vpop.f32.mrb[4].mxu0  ;;  %3148 = vtanh.bf16 %v1634_v20 }
 0x3cf   : > { %3150 = vtanh.bf16 %v1635_v41  ;;  %v1572_v42 = vpop.f32.mrb[5].mxu0  ;;  %v1581_v44 = vadd.f32 %v2759_v28, %v4253_v35 }
 0x3d0   : > { %v2760_v43 = vpop.f32.mrb[6].mxu0  ;;  %v1573_v48 = vadd.f32 %v4253_v35, %v1572_v42 }
 0x3d1   : > { %v1584_v45 = vadd.f32 %v2760_v43, %v4253_v35  ;;  %v1575_v46 = vpop.f32.mrb[7].mxu0 }
 0x3d2   : > { %v1576_v49 = vadd.f32 %v4253_v35, %v1575_v46 }
 0x3d3   : > { %v1637_v50 = vpack.c.bf16 %v1584_v45, %v1581_v44 }
 0x3d4   : > { %v1636_v51 = vpack.c.bf16 %v1576_v49, %v1573_v48 }
 0x3d6   : > { %3152 = vtanh.bf16 %v1636_v51  ;;  %v2763_v55 = vpop.f32.mrb[8].mxu0 }
 0x3d7   : > { %3154 = vtanh.bf16 %v1637_v50  ;;  %v1588_v52 = vpop.f32.mrb[9].mxu0  ;;  %v1597_v53 = vadd.f32 %v2763_v55, %v4253_v35 }
 0x3d8   : > { %v2764_v56 = vpop.f32.mrb[10].mxu0  ;;  %v1589_v61 = vadd.f32 %v4253_v35, %v1588_v52 }
 0x3d9   : > { %v3149_v57 = vpop.eup %3148  ;;  %v1600_v58 = vadd.f32 %v2764_v56, %v4253_v35  ;;  %v1591_v59 = vpop.f32.mrb[11].mxu0 }
 0x3da   : > { %v3151_v60 = vpop.eup %3150  ;;  %v1592_v62 = vadd.f32 %v4253_v35, %v1591_v59  ;;  %2789 = vmatprep.mubr.bf16.mxu1 %v3149_v57 }
 0x3db   : > { %v1639_v63 = vpack.c.bf16 %v1600_v58, %v1597_v53  ;;  %2790 = vmatmul.mubr.bf16.vlgmr.msra.gmra.mrb[0].mxu1 %v3151_v60 }
 0x3dc   : > { %v1638_v0 = vpack.c.bf16 %v1592_v62, %v1589_v61 }
 0x3de   : > { %3156 = vtanh.bf16 %v1638_v0  ;;  %v2767_v2 = vpop.f32.mrb[12].mxu0 }
 0x3df   : > { %3158 = vtanh.bf16 %v1639_v63  ;;  %v1604_v4 = vpop.f32.mrb[13].mxu0  ;;  %v1613_v8 = vadd.f32 %v2767_v2, %v4253_v35 }
 0x3e0   : > { %v2768_v5 = vpop.f32.mrb[14].mxu0  ;;  %v1605_v10 = vadd.f32 %v4253_v35, %v1604_v4 }
 0x3e1   : > { %v3153_v7 = vpop.eup %3152  ;;  %v1616_v32 = vadd.f32 %v2768_v5, %v4253_v35  ;;  %v1607_v37 = vpop.f32.mrb[15].mxu0 }
 0x3e2   : > { %v3155_v9 = vpop.eup %3154  ;;  %v1608_v11 = vadd.f32 %v4253_v35, %v1607_v37  ;;  %2793 = vmatprep.mubr.bf16.mxu1 %v3153_v7 }
 0x3e3   : > { %v1641_v12 = vpack.c.bf16 %v1616_v32, %v1613_v8  ;;  %2794 = vmatmul.mubr.bf16.gmra.mrb[4].mxu1 %v3155_v9 }
 0x3e4   : > { %v1640_v13 = vpack.c.bf16 %v1608_v11, %v1605_v10 }
 0x3e6   : > { %3160 = vtanh.bf16 %v1640_v13  ;;  %v2771_v15 = vpop.f32.mrb[16].mxu0 }
 0x3e7   : > { %3162 = vtanh.bf16 %v1641_v12  ;;  %v1629_v17 = vadd.f32 %v2771_v15, %v4253_v35  ;;  %v1620_v18 = vpop.f32.mrb[17].mxu0 }
 0x3e8   : > { %v2772_v19 = vpop.f32.mrb[18].mxu0  ;;  %v1621_v24 = vadd.f32 %v4253_v35, %v1620_v18 }
 0x3e9   : > { %v3157_v21 = vpop.eup %3156  ;;  %v1623_v22 = vpop.f32.mrb[19].mxu0  ;;  %v1643_v26 = vpack.c.bf16 %v1629_v17, %v1629_v17 }
 0x3ea   : > { %v3159_v23 = vpop.eup %3158  ;;  %v1624_v25 = vadd.f32 %v4253_v35, %v1623_v22  ;;  %2797 = vmatprep.mubr.bf16.mxu1 %v3157_v21 }
 0x3eb   : > { %2798 = vmatmul.mubr.bf16.gmra.mrb[8].mxu1 %v3159_v23 }
 0x3ec   : > { %v1642_v27 = vpack.c.bf16 %v1624_v25, %v1621_v24 }
 0x3ee   : > { %3164 = vtanh.bf16 %v1642_v27 }
 0x3ef   : > { %3166 = vtanh.bf16 %v1643_v26 }
 0x3f1   : > { %v3161_v47 = vpop.eup %3160 }
 0x3f2   : > { %v3163_v54 = vpop.eup %3162  ;;  %2801 = vmatprep.mubr.bf16.mxu1 %v3161_v47 }
 0x3f3   : > { %2802 = vmatmul.mubr.bf16.gmra.mrb[12].mxu1 %v3163_v54 }
 0x3f9   : > { %v3165_v29 = vpop.eup %3164 }
 0x3fa   : > { %v3167_v30 = vpop.eup %3166  ;;  %2805 = vmatprep.mubr.bf16.mxu1 %v3165_v29 }
 0x3fb   : > { %2806 = vmatmul.mubr.bf16.gmra.mrb[16].mxu1 %v3167_v30 }
 0x4ae   : > { %v2791_v31 = vpop.f32.mrb[0].mxu1 }
 0x4af   : > { %v1759_v1 = vpop.f32.mrb[1].mxu1  ;;  %v1768_v34 = vadd.f32 %v2791_v31, %v4277_v33 }
 0x4b0   : > { %v2792_v14 = vpop.f32.mrb[2].mxu1  ;;  %v1760_v38 = vadd.f32 %v4277_v33, %v1759_v1 }
 0x4b1   : > { %v1771_v35 = vadd.f32 %v2792_v14, %v4277_v33  ;;  %v1762_v36 = vpop.f32.mrb[3].mxu1 }
 0x4b2   : > { %v1763_v39 = vadd.f32 %v4277_v33, %v1762_v36 }
 0x4b3   : > { %v1838_v3 = vpack.c.bf16 %v1771_v35, %v1768_v34 }
 0x4b4   : > { %v1837_v6 = vpack.c.bf16 %v1763_v39, %v1760_v38 }
 0x4b5   : > { %3168 = vtanh.bf16 %v1838_v3 }
 0x4b6   : > { %3170 = vtanh.bf16 %v1837_v6  ;;  %v2795_v16 = vpop.f32.mrb[4].mxu1 }
 0x4b7   : > { %v1775_v40 = vpop.f32.mrb[5].mxu1  ;;  %v1784_v20 = vadd.f32 %v2795_v16, %v4277_v33 }
 0x4b8   : > { %v2796_v41 = vpop.f32.mrb[6].mxu1  ;;  %v1776_v43 = vadd.f32 %v4277_v33, %v1775_v40 }
 0x4b9   : > { %v1787_v28 = vadd.f32 %v2796_v41, %v4277_v33  ;;  %v1778_v42 = vpop.f32.mrb[7].mxu1 }
 0x4ba   : > { %v1779_v44 = vadd.f32 %v4277_v33, %v1778_v42 }
 0x4bb   : > { %v1840_v45 = vpack.c.bf16 %v1787_v28, %v1784_v20 }
 0x4bc   : > { %v1839_v46 = vpack.c.bf16 %v1779_v44, %v1776_v43 }
 0x4bd   : > { %3172 = vtanh.bf16 %v1840_v45 }
 0x4be   : > { %3174 = vtanh.bf16 %v1839_v46  ;;  %v2799_v48 = vpop.f32.mrb[8].mxu1 }
 0x4bf   : > { %v1791_v49 = vpop.f32.mrb[9].mxu1  ;;  %v1800_v57 = vadd.f32 %v2799_v48, %v4277_v33 }
 0x4c0   : > { %v3169_v50 = vpop.eup %3168  ;;  %v2800_v51 = vpop.f32.mrb[10].mxu1  ;;  %v1792_v61 = vadd.f32 %v4277_v33, %v1791_v49 }
 0x4c1   : > { %v3171_v55 = vpop.eup %3170  ;;  %v2571_v52 = vcombine.low %v3169_v50, %v3169_v50  ;;  %v2572_v56 = vcombine.high %v3169_v50, %v3169_v50  ;;  %v1803_v53 = vadd.f32 %v2800_v51, %v4277_v33  ;;  %v1794_v58 = vpop.f32.mrb[11].mxu1 }
 0x4c2   : > { %v2569_v59 = vcombine.low %v3171_v55, %v3171_v55  ;;  %v2570_v60 = vcombine.high %v3171_v55, %v3171_v55  ;;  %v1795_v62 = vadd.f32 %v4277_v33, %v1794_v58 }
 0x4c3   : > { %1926 = vst [vmem:[#allocation4 + $0x8] sm:$0xf] %v2571_v52  ;;  %1927 = vst [vmem:[#allocation4 + $0xc] sm:$0xf] %v2572_v56  ;;  %v1842_v63 = vpack.c.bf16 %v1803_v53, %v1800_v57 }
 0x4c4   : > { %1924 = vst [vmem:[#allocation4] sm:$0xf] %v2569_v59  ;;  %1925 = vst [vmem:[#allocation4 + $0x4] sm:$0xf] %v2570_v60  ;;  %v1841_v0 = vpack.c.bf16 %v1795_v62, %v1792_v61 }
 0x4c5   : > { %3176 = vtanh.bf16 %v1842_v63 }
 0x4c6   : > { %3178 = vtanh.bf16 %v1841_v0  ;;  %v2803_v2 = vpop.f32.mrb[12].mxu1 }
 0x4c7   : > { %v1807_v4 = vpop.f32.mrb[13].mxu1  ;;  %v1816_v9 = vadd.f32 %v2803_v2, %v4277_v33 }
 0x4c8   : > { %v3173_v5 = vpop.eup %3172  ;;  %v2804_v7 = vpop.f32.mrb[14].mxu1  ;;  %v1808_v15 = vadd.f32 %v4277_v33, %v1807_v4 }
 0x4c9   : > { %v3175_v8 = vpop.eup %3174  ;;  %v2575_v32 = vcombine.low %v3173_v5, %v3173_v5  ;;  %v2576_v37 = vcombine.high %v3173_v5, %v3173_v5  ;;  %v1819_v10 = vadd.f32 %v2804_v7, %v4277_v33  ;;  %v1810_v11 = vpop.f32.mrb[15].mxu1 }
 0x4ca   : > { %v2573_v12 = vcombine.low %v3175_v8, %v3175_v8  ;;  %v2574_v13 = vcombine.high %v3175_v8, %v3175_v8  ;;  %v1811_v17 = vadd.f32 %v4277_v33, %v1810_v11 }
 0x4cb   : > { %1930 = vst [vmem:[#allocation4 + $0x18] sm:$0xf] %v2575_v32  ;;  %1931 = vst [vmem:[#allocation4 + $0x1c] sm:$0xf] %v2576_v37  ;;  %v1844_v18 = vpack.c.bf16 %v1819_v10, %v1816_v9 }
 0x4cc   : > { %1928 = vst [vmem:[#allocation4 + $0x10] sm:$0xf] %v2573_v12  ;;  %1929 = vst [vmem:[#allocation4 + $0x14] sm:$0xf] %v2574_v13  ;;  %v1843_v19 = vpack.c.bf16 %v1811_v17, %v1808_v15 }
 0x4cd   : > { %3180 = vtanh.bf16 %v1844_v18 }
 0x4ce   : > { %3182 = vtanh.bf16 %v1843_v19  ;;  %v2807_v21 = vpop.f32.mrb[16].mxu1 }
 0x4cf   : > { %v1832_v22 = vadd.f32 %v2807_v21, %v4277_v33  ;;  %v1823_v23 = vpop.f32.mrb[17].mxu1 }
 0x4d0   : > { %v3177_v24 = vpop.eup %3176  ;;  %v2808_v25 = vpop.f32.mrb[18].mxu1  ;;  %v1824_v1 = vadd.f32 %v4277_v33, %v1823_v23 }
 0x4d1   : > { %v3179_v26 = vpop.eup %3178  ;;  %v2579_v27 = vcombine.low %v3177_v24, %v3177_v24  ;;  %v2580_v47 = vcombine.high %v3177_v24, %v3177_v24  ;;  %v1846_v54 = vpack.c.bf16 %v1832_v22, %v1832_v22  ;;  %v1826_v29 = vpop.f32.mrb[19].mxu1 }
 0x4d2   : > { %v2577_v30 = vcombine.low %v3179_v26, %v3179_v26  ;;  %v2578_v31 = vcombine.high %v3179_v26, %v3179_v26  ;;  %v1827_v14 = vadd.f32 %v4277_v33, %v1826_v29 }
 0x4d3   : > { %1934 = vst [vmem:[#allocation4 + $0x28] sm:$0xf] %v2579_v27  ;;  %1935 = vst [vmem:[#allocation4 + $0x2c] sm:$0xf] %v2580_v47  ;;  %3184 = vtanh.bf16 %v1846_v54 }
 0x4d4   : > { %1932 = vst [vmem:[#allocation4 + $0x20] sm:$0xf] %v2577_v30  ;;  %1933 = vst [vmem:[#allocation4 + $0x24] sm:$0xf] %v2578_v31  ;;  %v1845_v34 = vpack.c.bf16 %v1827_v14, %v1824_v1 }
 0x4d6   : > { %3186 = vtanh.bf16 %v1845_v34 }
 0x4d8   : > { %v3181_v35 = vpop.eup %3180 }
 0x4d9   : > { %v3183_v36 = vpop.eup %3182  ;;  %v2583_v38 = vcombine.low %v3181_v35, %v3181_v35  ;;  %v2584_v39 = vcombine.high %v3181_v35, %v3181_v35 }
 0x4da   : > { %v2581_v3 = vcombine.low %v3183_v36, %v3183_v36  ;;  %v2582_v6 = vcombine.high %v3183_v36, %v3183_v36 }
 0x4db   : > { %1938 = vst [vmem:[#allocation4 + $0x38] sm:$0xf] %v2583_v38  ;;  %1939 = vst [vmem:[#allocation4 + $0x3c] sm:$0xf] %v2584_v39 }
 0x4dc   : > { %1936 = vst [vmem:[#allocation4 + $0x30] sm:$0xf] %v2581_v3  ;;  %1937 = vst [vmem:[#allocation4 + $0x34] sm:$0xf] %v2582_v6 }
 0x4de   : > { %v3185_v16 = vpop.eup %3184 }
 0x4df   : > { %v2587_v40 = vcombine.low %v3185_v16, %v3185_v16 }
 0x4e1   : > { %v3187_v33 = vpop.eup %3186  ;;  %1942 = vst [vmem:[#allocation4 + $0x48] sm:$0xf] %v2587_v40 }
 0x4e2   : > { %v2585_v41 = vcombine.low %v3187_v33, %v3187_v33  ;;  %v2586_v20 = vcombine.high %v3187_v33, %v3187_v33 }
 0x4e4   : > { %1940 = vst [vmem:[#allocation4 + $0x40] sm:$0xf] %v2585_v41  ;;  %1941 = vst [vmem:[#allocation4 + $0x44] sm:$0xf] %v2586_v20 }
 0x4e5 PF: > { %s4626_s29 = sld [smem:[#allocation24_spill]] }
 0x4eb   : > { %p2588_p0 = scmp.lt.s32.totalorder %s4626_s29, 2 }
 0x4ec   : > { %v3188_v28 = vld [vmem:[%s4044_s21 + $0x4] ss:$8 sps:$4 sm:$0xff] (!%p2588_p0)   ;;  %v3190_v42 = vld [vmem:[%s4044_s21] ss:$8 sps:$4 sm:$0xff] (!%p2588_p0)   ;;  %v3568_v43 = vmov (!%p2588_p0), 0   ;;  %v3215_v63 = vld [vmem:[#allocation4 + $0x30] sm:$0xff] (!%p2588_p0)   ;;  %v1984_v32 = vlaneseq (!%p2588_p0) }
 0x4ed   : > { %1946 = sbr.rel (%p2588_p0) target bundleno = 1544 (0x608), region = 92  ;;  %2164 = vmatprep.mubr.bf16.mxu0 (!%p2588_p0), %v3568_v43  ;;  %2214 = vmatprep.mubr.bf16.mxu1 (!%p2588_p0), %v3568_v43  ;;  %v3191_v44 = vld [vmem:[%s4044_s21 + $0x14] ss:$8 sps:$4 sm:$0xff] (!%p2588_p0)   ;;  %v3193_v45 = vld [vmem:[%s4044_s21 + $0x10] ss:$8 sps:$4 sm:$0xff] (!%p2588_p0)   ;;  %v3212_v60 = vld [vmem:[#allocation4] sm:$0xff] (!%p2588_p0)  }
 0x4ee   : > { %2132 = vmatprep.subr.bf16.mxu0 (!%p2588_p0), %v3188_v28  ;;  %2825 = vmatprep.subr.bf16.mxu1 (!%p2588_p0), %v3188_v28  ;;  %v3194_v46 = vld [vmem:[%s4044_s21 + $0x24] ss:$8 sps:$4 sm:$0xff] (!%p2588_p0)   ;;  %v3196_v48 = vld [vmem:[%s4044_s21 + $0x20] ss:$8 sps:$4 sm:$0xff] (!%p2588_p0)   ;;  %v3197_v49 = vld [vmem:[%s4044_s21 + $0x34] ss:$8 sps:$4 sm:$0xff] (!%p2588_p0)  }
 0x4ef   : > { %2133 = vmatpush1.bf16.msra.mxu0 (!%p2588_p0), %v3190_v42  ;;  %2833 = vmatpush1.bf16.msra.mxu1 (!%p2588_p0), %v3190_v42  ;;  %v3199_v50 = vld [vmem:[%s4044_s21 + $0x30] ss:$8 sps:$4 sm:$0xff] (!%p2588_p0)   ;;  %v3200_v51 = vld [vmem:[%s4044_s21 + $0x44] ss:$8 sps:$4 sm:$0xff] (!%p2588_p0)   ;;  %v3202_v55 = vld [vmem:[%s4044_s21 + $0x40] ss:$8 sps:$4 sm:$0xff] (!%p2588_p0)  }
 0x4f0   : > { %2134 = vmatprep.subr.bf16.mxu0 (!%p2588_p0), %v3191_v44  ;;  %2826 = vmatprep.subr.bf16.mxu1 (!%p2588_p0), %v3191_v44  ;;  %v3203_v52 = vld [vmem:[%s4044_s21 + $0x54] ss:$8 sps:$4 sm:$0xff] (!%p2588_p0)   ;;  %v3205_v56 = vld [vmem:[%s4044_s21 + $0x50] ss:$8 sps:$4 sm:$0xff] (!%p2588_p0)   ;;  %v3206_v57 = vld [vmem:[%s4044_s21 + $0x64] ss:$8 sps:$4 sm:$0xff] (!%p2588_p0)  }
 0x4f1   : > { %v3208_v53 = vld [vmem:[%s4044_s21 + $0x60] ss:$8 sps:$4 sm:$0xff] (!%p2588_p0)   ;;  %v3209_v58 = vld [vmem:[%s4044_s21 + $0x74] ss:$8 sps:$4 sm:$0xff] (!%p2588_p0)   ;;  %v3211_v59 = vld [vmem:[%s4044_s21 + $0x70] ss:$8 sps:$4 sm:$0xff] (!%p2588_p0)  }
 0x4f2   : > { %v3213_v61 = vld [vmem:[#allocation4 + $0x28] sm:$0xff] (!%p2588_p0)   ;;  %v3216_v0 = vld [vmem:[#allocation4 + $0x10] sm:$0xff] (!%p2588_p0)   ;;  %v3217_v2 = vld [vmem:[#allocation4 + $0x38] sm:$0xff] (!%p2588_p0)   ;;  %v1985_v37 = vshrl.u32 (!%p2588_p0), %v1984_v32, 7 }
 0x4f3   : > { %2135 = vmatpush1.bf16.msra.mxu0 (!%p2588_p0), %v3193_v45  ;;  %2834 = vmatpush1.bf16.msra.mxu1 (!%p2588_p0), %v3193_v45  ;;  %v3214_v62 = vld [vmem:[#allocation4 + $0x8] sm:$0xff] (!%p2588_p0)   ;;  %v3218_v4 = vld [vmem:[#allocation4 + $0x18] sm:$0xff] (!%p2588_p0)   ;;  %v3219_v5 = vld [vmem:[#allocation4 + $0x40] sm:$0xff] (!%p2588_p0)  }
 0x4f4   : > { %2136 = vmatprep.subr.bf16.mxu0 %v3194_v46  ;;  %2827 = vmatprep.subr.bf16.mxu1 %v3194_v46  ;;  %v3220_v7 = vld [vmem:[#allocation4 + $0x20] sm:$0xff]   ;;  %v3221_v8 = vld [vmem:[#allocation4 + $0x48] ss:$0 sps:$4 sm:$0xff]   ;;  %v1986_v9 = vsub.s32 0, %v1985_v37  ;;  %v1982_v10 = vld [vmem:[%s549_s9] sm:$0x3] }
 0x4f5   : > { %v1990_v11 = vsub.s32 1, %v1985_v37 }
 0x4f6   : > { %v4330_v12 = vrot.slane %v1982_v10, %v1986_v9 }
 0x4f7   : > { %2137 = vmatpush1.bf16.msra.mxu0 %v3196_v48  ;;  %2835 = vmatpush1.bf16.msra.mxu1 %v3196_v48  ;;  %v4332_v13 = vrot.slane %v1982_v10, %v1990_v11 }
 0x4f8   : > { %2138 = vmatprep.subr.bf16.mxu0 %v3197_v49  ;;  %2828 = vmatprep.subr.bf16.mxu1 %v3197_v49 }
 0x4fb   : > { %2139 = vmatpush1.bf16.msra.mxu0 %v3199_v50  ;;  %2836 = vmatpush1.bf16.msra.mxu1 %v3199_v50 }
 0x4fc   : > { %2140 = vmatprep.subr.bf16.mxu0 %v3200_v51  ;;  %2829 = vmatprep.subr.bf16.mxu1 %v3200_v51 }
 0x4ff   : > { %2141 = vmatpush1.bf16.msra.mxu0 %v3202_v55  ;;  %2837 = vmatpush1.bf16.msra.mxu1 %v3202_v55 }
 0x500   : > { %2142 = vmatprep.subr.bf16.mxu0 %v3203_v52  ;;  %2830 = vmatprep.subr.bf16.mxu1 %v3203_v52 }
 0x503   : > { %2143 = vmatpush1.bf16.msra.mxu0 %v3205_v56  ;;  %2838 = vmatpush1.bf16.msra.mxu1 %v3205_v56 }
 0x504   : > { %2144 = vmatprep.subr.bf16.mxu0 %v3206_v57  ;;  %2831 = vmatprep.subr.bf16.mxu1 %v3206_v57 }
 0x507   : > { %2145 = vmatpush1.bf16.msra.mxu0 %v3208_v53  ;;  %2839 = vmatpush1.bf16.msra.mxu1 %v3208_v53 }
 0x508   : > { %2146 = vmatprep.subr.bf16.mxu0 %v3209_v58  ;;  %2832 = vmatprep.subr.bf16.mxu1 %v3209_v58 }
 0x50b   : > { %2147 = vmatpush1.bf16.msra.mxu0 %v3211_v59  ;;  %2840 = vmatpush1.bf16.msra.mxu1 %v3211_v59 }
 0x50e   : > { %2165 = vmatmul.mubr.bf16.vlgmr.msra.gmra.mrb[0].mxu0 %v3212_v60  ;;  %2215 = vmatmul.mubr.bf16.vlgmr.msra.gmra.mrb[0].mxu1 %v3213_v61 }
 0x50f   : > { %2174 = vmatprep.mubr.bf16.mxu0 %v3568_v43  ;;  %2224 = vmatprep.mubr.bf16.mxu1 %v3568_v43 }
 0x516   : > { %2175 = vmatmul.mubr.bf16.gmra.mrb[4].mxu0 %v3214_v62  ;;  %2225 = vmatmul.mubr.bf16.gmra.mrb[4].mxu1 %v3215_v63 }
 0x517   : > { %2184 = vmatprep.mubr.bf16.mxu0 %v3568_v43  ;;  %2234 = vmatprep.mubr.bf16.mxu1 %v3568_v43 }
 0x51e   : > { %2185 = vmatmul.mubr.bf16.gmra.mrb[8].mxu0 %v3216_v0  ;;  %2235 = vmatmul.mubr.bf16.gmra.mrb[8].mxu1 %v3217_v2 }
 0x51f   : > { %2194 = vmatprep.mubr.bf16.mxu0 %v3568_v43  ;;  %2244 = vmatprep.mubr.bf16.mxu1 %v3568_v43 }
 0x526   : > { %2195 = vmatmul.mubr.bf16.gmra.mrb[12].mxu0 %v3218_v4  ;;  %2245 = vmatmul.mubr.bf16.gmra.mrb[12].mxu1 %v3219_v5 }
 0x527   : > { %2204 = vmatprep.mubr.bf16.mxu0 %v3568_v43  ;;  %2254 = vmatprep.mubr.bf16.mxu1 %v3568_v43 }
 0x52e   : > { %2205 = vmatmul.mubr.bf16.gmra.mrb[16].mxu0 %v3220_v7  ;;  %2255 = vmatmul.mubr.bf16.gmra.mrb[16].mxu1 %v3221_v8 }
 0x5e1   : > { %v2166_v15 = vpop.f32.mrb[0].mxu0  ;;  %v2216_v17 = vpop.f32.mrb[0].mxu1 }
 0x5e2   : > { %v2167_v18 = vadd.f32 %v2166_v15, %v4330_v12  ;;  %v2217_v19 = vadd.f32 %v2216_v17, %v4330_v12  ;;  %v2168_v21 = vpop.f32.mrb[1].mxu0  ;;  %v2218_v22 = vpop.f32.mrb[1].mxu1 }
 0x5e3   : > { %v2169_v23 = vadd.f32 %v2168_v21, %v4332_v13  ;;  %v2219_v24 = vadd.f32 %v2218_v22, %v4332_v13  ;;  %v2170_v25 = vpop.f32.mrb[2].mxu0  ;;  %v2220_v26 = vpop.f32.mrb[2].mxu1 }
 0x5e4   : > { %2263 = vst [vmem:[%s4064_s18] sm:$0xff] %v2167_v18  ;;  %2283 = vst [vmem:[%s4064_s18 + $0xa0] sm:$0xff] %v2217_v19  ;;  %v2171_v27 = vadd.f32 %v2170_v25, %v4330_v12  ;;  %v2221_v47 = vadd.f32 %v2220_v26, %v4330_v12  ;;  %v2172_v54 = vpop.f32.mrb[3].mxu0  ;;  %v2222_v29 = vpop.f32.mrb[3].mxu1 }
 0x5e5   : > { %2264 = vst [vmem:[%s4064_s18 + $0x8] sm:$0xff] %v2169_v23  ;;  %2284 = vst [vmem:[%s4064_s18 + $0xa8] sm:$0xff] %v2219_v24  ;;  %v2173_v30 = vadd.f32 %v2172_v54, %v4332_v13  ;;  %v2223_v31 = vadd.f32 %v2222_v29, %v4332_v13 }
 0x5e6   : > { %2265 = vst [vmem:[%s4064_s18 + $0x10] sm:$0xff] %v2171_v27  ;;  %2285 = vst [vmem:[%s4064_s18 + $0xb0] sm:$0xff] %v2221_v47 }
 0x5e7   : > { %2266 = vst [vmem:[%s4064_s18 + $0x18] sm:$0xff] %v2173_v30  ;;  %2286 = vst [vmem:[%s4064_s18 + $0xb8] sm:$0xff] %v2223_v31 }
 0x5e9   : > { %v2176_v1 = vpop.f32.mrb[4].mxu0  ;;  %v2226_v14 = vpop.f32.mrb[4].mxu1 }
 0x5ea   : > { %v2177_v34 = vadd.f32 %v2176_v1, %v4330_v12  ;;  %v2227_v35 = vadd.f32 %v2226_v14, %v4330_v12  ;;  %v2178_v36 = vpop.f32.mrb[5].mxu0  ;;  %v2228_v38 = vpop.f32.mrb[5].mxu1 }
 0x5eb   : > { %v2179_v39 = vadd.f32 %v2178_v36, %v4332_v13  ;;  %v2229_v3 = vadd.f32 %v2228_v38, %v4332_v13  ;;  %v2180_v6 = vpop.f32.mrb[6].mxu0  ;;  %v2230_v16 = vpop.f32.mrb[6].mxu1 }
 0x5ec   : > { %2267 = vst [vmem:[%s4064_s18 + $0x20] sm:$0xff] %v2177_v34  ;;  %2287 = vst [vmem:[%s4064_s18 + $0xc0] sm:$0xff] %v2227_v35  ;;  %v2181_v40 = vadd.f32 %v2180_v6, %v4330_v12  ;;  %v2231_v33 = vadd.f32 %v2230_v16, %v4330_v12  ;;  %v2182_v41 = vpop.f32.mrb[7].mxu0  ;;  %v2232_v20 = vpop.f32.mrb[7].mxu1 }
 0x5ed   : > { %2268 = vst [vmem:[%s4064_s18 + $0x28] sm:$0xff] %v2179_v39  ;;  %2288 = vst [vmem:[%s4064_s18 + $0xc8] sm:$0xff] %v2229_v3  ;;  %v2183_v28 = vadd.f32 %v2182_v41, %v4332_v13  ;;  %v2233_v42 = vadd.f32 %v2232_v20, %v4332_v13 }
 0x5ee   : > { %2269 = vst [vmem:[%s4064_s18 + $0x30] sm:$0xff] %v2181_v40  ;;  %2289 = vst [vmem:[%s4064_s18 + $0xd0] sm:$0xff] %v2231_v33 }
 0x5ef   : > { %2270 = vst [vmem:[%s4064_s18 + $0x38] sm:$0xff] %v2183_v28  ;;  %2290 = vst [vmem:[%s4064_s18 + $0xd8] sm:$0xff] %v2233_v42 }
 0x5f1   : > { %v2186_v43 = vpop.f32.mrb[8].mxu0  ;;  %v2236_v44 = vpop.f32.mrb[8].mxu1 }
 0x5f2   : > { %v2187_v45 = vadd.f32 %v2186_v43, %v4330_v12  ;;  %v2237_v46 = vadd.f32 %v2236_v44, %v4330_v12  ;;  %v2188_v48 = vpop.f32.mrb[9].mxu0  ;;  %v2238_v49 = vpop.f32.mrb[9].mxu1 }
 0x5f3   : > { %v2189_v50 = vadd.f32 %v2188_v48, %v4332_v13  ;;  %v2239_v51 = vadd.f32 %v2238_v49, %v4332_v13  ;;  %v2190_v55 = vpop.f32.mrb[10].mxu0  ;;  %v2240_v52 = vpop.f32.mrb[10].mxu1 }
 0x5f4   : > { %2271 = vst [vmem:[%s4064_s18 + $0x40] sm:$0xff] %v2187_v45  ;;  %2291 = vst [vmem:[%s4064_s18 + $0xe0] sm:$0xff] %v2237_v46  ;;  %v2191_v56 = vadd.f32 %v2190_v55, %v4330_v12  ;;  %v2241_v57 = vadd.f32 %v2240_v52, %v4330_v12  ;;  %v2192_v53 = vpop.f32.mrb[11].mxu0  ;;  %v2242_v58 = vpop.f32.mrb[11].mxu1 }
 0x5f5   : > { %2272 = vst [vmem:[%s4064_s18 + $0x48] sm:$0xff] %v2189_v50  ;;  %2292 = vst [vmem:[%s4064_s18 + $0xe8] sm:$0xff] %v2239_v51  ;;  %v2193_v59 = vadd.f32 %v2192_v53, %v4332_v13  ;;  %v2243_v60 = vadd.f32 %v2242_v58, %v4332_v13 }
 0x5f6   : > { %2273 = vst [vmem:[%s4064_s18 + $0x50] sm:$0xff] %v2191_v56  ;;  %2293 = vst [vmem:[%s4064_s18 + $0xf0] sm:$0xff] %v2241_v57 }
 0x5f7   : > { %2274 = vst [vmem:[%s4064_s18 + $0x58] sm:$0xff] %v2193_v59  ;;  %2294 = vst [vmem:[%s4064_s18 + $0xf8] sm:$0xff] %v2243_v60 }
 0x5f9   : > { %v2196_v61 = vpop.f32.mrb[12].mxu0  ;;  %v2246_v62 = vpop.f32.mrb[12].mxu1 }
 0x5fa   : > { %v2197_v63 = vadd.f32 %v2196_v61, %v4330_v12  ;;  %v2247_v0 = vadd.f32 %v2246_v62, %v4330_v12  ;;  %v2198_v2 = vpop.f32.mrb[13].mxu0  ;;  %v2248_v4 = vpop.f32.mrb[13].mxu1 }
 0x5fb   : > { %v2199_v5 = vadd.f32 %v2198_v2, %v4332_v13  ;;  %v2249_v7 = vadd.f32 %v2248_v4, %v4332_v13  ;;  %v2200_v8 = vpop.f32.mrb[14].mxu0  ;;  %v2250_v32 = vpop.f32.mrb[14].mxu1 }
 0x5fc   : > { %2275 = vst [vmem:[%s4064_s18 + $0x60] sm:$0xff] %v2197_v63  ;;  %2295 = vst [vmem:[%s4064_s18 + $0x100] sm:$0xff] %v2247_v0  ;;  %v2201_v37 = vadd.f32 %v2200_v8, %v4330_v12  ;;  %v2251_v9 = vadd.f32 %v2250_v32, %v4330_v12  ;;  %v2202_v10 = vpop.f32.mrb[15].mxu0  ;;  %v2252_v11 = vpop.f32.mrb[15].mxu1 }
 0x5fd   : > { %2276 = vst [vmem:[%s4064_s18 + $0x68] sm:$0xff] %v2199_v5  ;;  %2296 = vst [vmem:[%s4064_s18 + $0x108] sm:$0xff] %v2249_v7  ;;  %v2203_v15 = vadd.f32 %v2202_v10, %v4332_v13  ;;  %v2253_v17 = vadd.f32 %v2252_v11, %v4332_v13 }
 0x5fe   : > { %2277 = vst [vmem:[%s4064_s18 + $0x70] sm:$0xff] %v2201_v37  ;;  %2297 = vst [vmem:[%s4064_s18 + $0x110] sm:$0xff] %v2251_v9 }
 0x5ff   : > { %2278 = vst [vmem:[%s4064_s18 + $0x78] sm:$0xff] %v2203_v15  ;;  %2298 = vst [vmem:[%s4064_s18 + $0x118] sm:$0xff] %v2253_v17 }
 0x601   : > { %v2206_v18 = vpop.f32.mrb[16].mxu0  ;;  %v2256_v19 = vpop.f32.mrb[16].mxu1 }
 0x602   : > { %v2207_v21 = vadd.f32 %v2206_v18, %v4330_v12  ;;  %v2257_v22 = vadd.f32 %v2256_v19, %v4330_v12  ;;  %v2208_v23 = vpop.f32.mrb[17].mxu0  ;;  %v2258_v24 = vpop.f32.mrb[17].mxu1 }
 0x603   : > { %v2209_v25 = vadd.f32 %v2208_v23, %v4332_v13  ;;  %v2259_v26 = vadd.f32 %v2258_v24, %v4332_v13  ;;  %v2210_v27 = vpop.f32.mrb[18].mxu0  ;;  %v2260_v47 = vpop.f32.mrb[18].mxu1 }
 0x604   : > { %2279 = vst [vmem:[%s4064_s18 + $0x80] sm:$0xff] %v2207_v21  ;;  %2299 = vst [vmem:[%s4064_s18 + $0x120] sm:$0xff] %v2257_v22  ;;  %v2211_v54 = vadd.f32 %v2210_v27, %v4330_v12  ;;  %v2212_v29 = vpop.f32.mrb[19].mxu0  ;;  %v2261_v30 = vpop.f32.mrb[19].mxu1 }
 0x605   : > { %2280 = vst [vmem:[%s4064_s18 + $0x88] sm:$0xff] %v2209_v25  ;;  %2300 = vst [vmem:[%s4064_s18 + $0x128] sm:$0xff] %v2259_v26  ;;  %v2213_v31 = vadd.f32 %v2212_v29, %v4332_v13 }
 0x606   : > { %2281 = vst [vmem:[%s4064_s18 + $0x90] sm:$0xff] %v2211_v54 }
 0x607   : > { %2282 = vst [vmem:[%s4064_s18 + $0x98] sm:$0xff] %v2213_v31 }
 0x608 PF: > { %s4628_s2 = sld [smem:[#allocation25_spill]]  ;;  %s4630_s12 = sld [smem:[#allocation28_spill]] }
 0x609   : > { %s2321_s28 = sshll.u32 %s4064_s18, 4  ;;  %s4631_s30 = sld [smem:[#allocation44_spill]]  ;;  %s4413_s28 = int_to_ptr.vmem [resolvable:$true] %s2321_s28 }
 0x60a   : > { %s4422_s21 = scalar_lea.sflag [#allocation7], %s529_s19  ;;  %s3368_s10 = scalar_lea.vmem %s4413_s28, 4864 }
 0x60b   : > { %p3369_p9 = scmp.ne.s32.totalorder %s4413_s28, %s3368_s10 }
 0x60e   : > { %s2624_s3 = smul.u32 76, %s4628_s2  ;;  %p4633_p1 = scmp.ne.s32.totalorder %s4630_s12, 0 }
 0x60f   : > { %s4632_s5 = smov %s4631_s30 }
 0x610   : > { %s2318_s4 = sadd.s32 %s2624_s3, %s4054_s26  ;;  %p3370_p8 = pnand %p3369_p9, %p4633_p1 }
 0x611   : > { %s2618_s7 = sshll.u32 %s2318_s4, 7  ;;  %s3569_s26 = smov [#allocation14]  }
 0x612   : > { %s4418_s29 = scalar_lea.hbm %s4631_s30, %s2618_s7  ;;  %p3371_p11 = pneg %p3370_p8 }
 0x613   : > { %s3372_s18 = sshll.u32 %s3569_s26, 4  ;;  %s3373_s18 = int_to_ptr.vmem [resolvable:$false] %s3372_s18 }
 0x614   : > { %s3374_s8 = scalar_lea.vmem %s3373_s18, 9728  ;;  %p3375_p10 = scmp.lt.s32.totalorder %s4413_s28, %s3373_s18 }
 0x615   : > { %p3376_p4 = scmp.lt.s32.totalorder %s3374_s8, %s3368_s10 }
 0x617   : > { %p3377_p3 = por %p3376_p4, %p3375_p10 }
 0x619   : > { %p3378_p6 = pnand %p3377_p3, %p3371_p11 }
 0x61b   : > { %3381 = shalt.err (!%p3378_p6)
}
 0x61c   : > { %s3382_s19 = scalar_lea.hbm %s4418_s29, 4864  ;;  %s3386_s3 = scalar_lea.hbm %s4632_s5, 19456 }
 0x61d   : > { %p3383_p12 = scmp.ne.s32.totalorder %s4418_s29, %s3382_s19  ;;  %p3387_p2 = scmp.lt.u32.totalorder %s4418_s29, %s4632_s5 }
 0x61e   : > { %p3388_p5 = scmp.lt.u32.totalorder %s3386_s3, %s3382_s19  ;;  %p3390_p9 = scmp.lt.u32.totalorder %s3382_s19, %s4418_s29 }
 0x61f   : > { %p3384_p13 = pnand %p3383_p12, %p4633_p1 }
 0x620   : > { %p3389_p0 = por %p3388_p5, %p3387_p2 }
 0x621   : > { %p3385_p7 = pneg %p3384_p13 }
 0x622   : > { %p3391_p8 = por %p3390_p9, %p3389_p0 }
 0x624   : > { %p3392_p11 = pnand %p3391_p8, %p3385_p7 }
 0x626   : > { %3395 = shalt.err (!%p3392_p11)
}
 0x627   : > { %s3570_s15 = smov 256   ;;  %s3571_s0 = smov 512  }
 0x628   : > { %s3572_s30 = smov 16  }
 0x629   : > { %2858 = dma.vmem_to_hbm [thread:$0]  (%p4633_p1), %s4413_s28, 4864, %s4418_s29, %s4422_s21, %s3570_s15, %s3571_s0, %s3572_s30  }
 0x62a PF: > { %s4634_s10 = sld [smem:[#allocation21_spill]]  ;;  %s4635_s26 = sld [smem:[#allocation29_spill]] }
 0x62b   : > { %p2886_p10 = scmp.ge.s32.totalorder %s3554_s25, 2 }
 0x630   : > { %s2336_s18 = sand.u32 1, %s4634_s10   ;;  %p4636_p4 = scmp.ne.s32.totalorder %s4635_s26, 0 }
 0x631   : > { %s2337_s8 = scalar_lea.sflag [#allocation7], %s2336_s18 }
 0x632   : > { %p2878_p3 = pnand %p2886_p10, %p4636_p4 }
 0x634   : > { %3485 = dma.done.wait (!%p2878_p3), %s2337_s8, 4864  }
 0x635   : > { %3487 = vsyncadd (!%p2878_p3), %s2337_s8, 4294962432  ;;  %s29_s25 = sadd.s32 1, %s3554_s25   ;;  %s4638_s30 = sld [smem:[#allocation22_spill]] }
 0x636   : > { %p4451_p6 = scmp.ge.s32.totalorder %s29_s25, 10   ;;  %s4639_s18 = sld [smem:[#allocation23_spill]] }
 0x637   : > { %s4640_s28 = sld [smem:[#allocation34_spill]]  ;;  %s4641_s29 = sld [smem:[#allocation26_spill]] }
 0x638   : > { %s4642_s2 = sld [smem:[#allocation31_spill]]  ;;  %s4643_s10 = smov %s3498_s11 }
 0x639   : > { %s4645_s11 = smov %s3974_s6  ;;  %s4646_s12 = smov %s3506_s13 }
 0x63a   : > { %s4647_s13 = smov %s3510_s14  ;;  %s4648_s14 = smov %s3971_s22 }
 0x63b   : > { %s4649_s15 = smov %s3518_s16  ;;  %s4650_s16 = smov %s3522_s17 }
 0x63c   : > { %s4651_s17 = smov %s3896_s24  ;;  %s4652_s19 = smov %s3534_s20 }
 0x63d   : > { %s4653_s20 = smov %s4640_s28  ;;  %s4654_s21 = smov %s3546_s23 }
 0x63e   : > { %s4655_s22 = smov %s4641_s29  ;;  %s4656_s23 = smov %s4659_s27 }
 0x63f   : > { %s4657_s24 = smov %s4642_s2  ;;  %28 = sbr.rel (!%p4451_p6) target bundleno = 26 (0x1a), region = 152 }
 0x646   :  { %2342 = vsyncpa [#allocation6], 1 }
 0x647   :  { %2344 = vsyncpa [#allocation6 + $0x1], 1 }
 0x648   :  { %2345 = vsyncpa [#allocation9], 1 }
 0x649   :  { %2347 = vsyncpa [#allocation9 + $0x1], 1 }
 0x64a   :  { %2348 = vsyncpa [#allocation12], 1 }
 0x64b   :  { %2349 = vsyncpa [#allocation7], 1 }
 0x64c   :  { %2351 = vsyncpa [#allocation7 + $0x1], 1 }

</bundles_post_ra>
